<compile_context>
chip_gen: v7x
topology: tpu7x:2x2x1
jax: 0.10.0
libtpu: 0.0.40
codegen_flags: <defaults>
</compile_context>

<pallas_src>
import math
import functools

import jax
import jax.numpy as jnp
from jax.experimental import pallas as pl
from jax.experimental.pallas import tpu as pltpu

EPS = float(jnp.finfo(jnp.float32).eps)   # torch F.rms_norm default eps for fp32
NEG_LARGE = -1e30                         # finite causal-mask value (no -inf/NaN hazard)
VMEM_LIMIT_BYTES = 48 * 1024 * 1024       # safe on v5e/v6e (128 MiB) and v7x (64 MiB)

# TODO(synk): for long sequences (T=2048) convert the attention kernel to a
#   flash-style online-softmax with a KV grid axis so the TxT scores never
#   materialize (required to fit v7x's 64 MiB VMEM).
# TODO(synk): optionally cast matmul operands to bf16 (keep f32 accumulation /
#   f32 elementwise math) for v6e/v7x MXU throughput; kept f32 here to match
#   the fp32 PyTorch reference numerics.


def _compiler_params(n_parallel=1):
    return pltpu.CompilerParams(
        dimension_semantics=("parallel",) * n_parallel,
        vmem_limit_bytes=VMEM_LIMIT_BYTES,
    )


def _row_tile(m, preferred=256):
    """Largest row tile <= preferred that divides m (multiples of 8), else full."""
    for t in (512, 256, 128, 64, 32, 16, 8):
        if t <= preferred and m % t == 0:
            return t
    return m


# ----------------------------- fused row-tiled GEMM kernels ----------------------------- #

def _norm_qkv_kernel(x_ref, w_ref, b_ref, o_ref):
    # rms_norm(x_tile) @ W_attn + b_attn   (norm fused into the QKV projection)
    x = x_ref[...].astype(jnp.float32)
    xn = x * jax.lax.rsqrt(jnp.mean(x * x, axis=-1, keepdims=True) + EPS)
    o_ref[...] = (jnp.dot(xn, w_ref[...], preferred_element_type=jnp.float32)
                  + b_ref[...]).astype(o_ref.dtype)


def fused_norm_qkv(x2d, w, b, *, tm):
    m, c = x2d.shape
    n = w.shape[1]
    return pl.pallas_call(
        _norm_qkv_kernel,
        out_shape=jax.ShapeDtypeStruct((m, n), x2d.dtype),
        grid=(m // tm,),
        in_specs=[pl.BlockSpec((tm, c), lambda i: (i, 0)),
                  pl.BlockSpec((c, n), lambda i: (0, 0)),
                  pl.BlockSpec((1, n), lambda i: (0, 0))],
        out_specs=pl.BlockSpec((tm, n), lambda i: (i, 0)),
        compiler_params=_compiler_params(1),
    )(x2d, w, b)


def _proj_add_kernel(y_ref, w_ref, b_ref, res_ref, o_ref):
    # residual + y_tile @ W_proj + b_proj   (residual add fused into the projection)
    o_ref[...] = (res_ref[...].astype(jnp.float32)
                  + jnp.dot(y_ref[...], w_ref[...], preferred_element_type=jnp.float32)
                  + b_ref[...]).astype(o_ref.dtype)


def fused_proj_residual(y2d, w, b, res2d, *, tm):
    m, k = y2d.shape
    n = w.shape[1]
    return pl.pallas_call(
        _proj_add_kernel,
        out_shape=jax.ShapeDtypeStruct((m, n), res2d.dtype),
        grid=(m // tm,),
        in_specs=[pl.BlockSpec((tm, k), lambda i: (i, 0)),
                  pl.BlockSpec((k, n), lambda i: (0, 0)),
                  pl.BlockSpec((1, n), lambda i: (0, 0)),
                  pl.BlockSpec((tm, n), lambda i: (i, 0))],
        out_specs=pl.BlockSpec((tm, n), lambda i: (i, 0)),
        compiler_params=_compiler_params(1),
    )(y2d, w, b, res2d)


def _norm_mlp_add_kernel(x_ref, w1_ref, b1_ref, w2_ref, b2_ref, o_ref):
    # residual + relu(rms_norm(x_tile) @ W_fc + b_fc)^2 @ W_proj2 + b_proj2
    x = x_ref[...].astype(jnp.float32)
    xn = x * jax.lax.rsqrt(jnp.mean(x * x, axis=-1, keepdims=True) + EPS)
    h = jnp.dot(xn, w1_ref[...], preferred_element_type=jnp.float32) + b1_ref[...]
    h = jnp.maximum(h, 0.0)
    h = h * h                                    # F.relu(x).square()
    o_ref[...] = (x + jnp.dot(h, w2_ref[...], preferred_element_type=jnp.float32)
                  + b2_ref[...]).astype(o_ref.dtype)


def fused_norm_mlp_residual(x2d, w1, b1, w2, b2, *, tm):
    m, c = x2d.shape
    h = w1.shape[1]
    return pl.pallas_call(
        _norm_mlp_add_kernel,
        out_shape=jax.ShapeDtypeStruct((m, c), x2d.dtype),
        grid=(m // tm,),
        in_specs=[pl.BlockSpec((tm, c), lambda i: (i, 0)),
                  pl.BlockSpec((c, h), lambda i: (0, 0)),
                  pl.BlockSpec((1, h), lambda i: (0, 0)),
                  pl.BlockSpec((h, c), lambda i: (0, 0)),
                  pl.BlockSpec((1, c), lambda i: (0, 0))],
        out_specs=pl.BlockSpec((tm, c), lambda i: (i, 0)),
        compiler_params=_compiler_params(1),
    )(x2d, w1, b1, w2, b2)


# ----------------------------- attention kernel ----------------------------- #

def _attn_kernel(qkv_ref, cos_ref, sin_ref, o_ref, *, n_head, head_dim):
    # One batch row per grid step; heads looped (statically unrolled) inside.
    c_total = n_head * head_dim
    d2 = head_dim // 2
    scale = 1.0 / math.sqrt(head_dim)

    qkv = qkv_ref[0].astype(jnp.float32)          # (T, 3C) straight from fused QKV
    cos_t = cos_ref[...]                          # (nh, hs//2) head-indexed tables
    sin_t = sin_ref[...]

    t_len = qkv.shape[0]
    row = jax.lax.broadcasted_iota(jnp.int32, (t_len, t_len), 0)
    col = jax.lax.broadcasted_iota(jnp.int32, (t_len, t_len), 1)
    causal = col <= row

    for h in range(n_head):
        q = qkv[:, h * head_dim:(h + 1) * head_dim]
        k = qkv[:, c_total + h * head_dim:c_total + (h + 1) * head_dim]
        v = qkv[:, 2 * c_total + h * head_dim:2 * c_total + (h + 1) * head_dim]

        # q/k rms-norm over head_dim; fold 1/sqrt(hs) into the q factor.
        qn = q * (jax.lax.rsqrt(jnp.mean(q * q, axis=-1, keepdims=True) + EPS) * scale)
        kn = k * jax.lax.rsqrt(jnp.mean(k * k, axis=-1, keepdims=True) + EPS)

        # per-head rotary constants (seq_len == n_head quirk of the PyTorch module)
        ch = cos_t[h:h + 1, :]                    # (1, hs//2)
        sh = sin_t[h:h + 1, :]
        q1, q2 = qn[:, :d2], qn[:, d2:]
        k1, k2 = kn[:, :d2], kn[:, d2:]
        aq = q1 * ch + q2 * sh
        bq = q2 * ch - q1 * sh
        ak = k1 * ch + k2 * sh
        bk = k2 * ch - k1 * sh

        # qr @ kr.T computed as two half-width matmuls (no concatenate needed)
        scores = (jnp.dot(aq, ak.T, preferred_element_type=jnp.float32)
                  + jnp.dot(bq, bk.T, preferred_element_type=jnp.float32))
        scores = jnp.where(causal, scores, NEG_LARGE)
        scores = scores - jnp.max(scores, axis=-1, keepdims=True)
        p = jnp.exp(scores)
        p = p * pl.reciprocal(jnp.sum(p, axis=-1, keepdims=True), approx=True)

        o_ref[0, :, h * head_dim:(h + 1) * head_dim] = (
            jnp.dot(p, v, preferred_element_type=jnp.float32).astype(o_ref.dtype))


def attention(qkv3d, cos, sin, *, n_head, out_dtype):
    bb, t_len, three_c = qkv3d.shape
    c = three_c // 3
    kernel = functools.partial(_attn_kernel, n_head=n_head, head_dim=c // n_head)
    return pl.pallas_call(
        kernel,
        out_shape=jax.ShapeDtypeStruct((bb, t_len, c), out_dtype),
        grid=(bb,),
        in_specs=[pl.BlockSpec((1, t_len, three_c), lambda b: (b, 0, 0)),
                  pl.BlockSpec(cos.shape, lambda b: (0, 0)),
                  pl.BlockSpec(sin.shape, lambda b: (0, 0))],
        out_specs=pl.BlockSpec((1, t_len, c), lambda b: (b, 0, 0)),
        compiler_params=_compiler_params(1),
    )(qkv3d, cos, sin)


# ------------------------------ Block forward ------------------------------ #

@functools.partial(jax.jit, static_argnames=("n_head",))
def block_forward(x, params, n_head):
    bb, t_len, c = x.shape
    hs = c // n_head
    bt = bb * t_len
    tm = _row_tile(bt)

    x2d = x.reshape(bt, c)

    # --- attention branch: x = x + c_proj(attn(rms_norm(x))) ---
    qkv = fused_norm_qkv(x2d, params["w_attn"], params["b_attn"], tm=tm)      # (BT, 3C)

    # Rotary tables indexed by HEAD (seq_len == n_head — faithful to the module).
    inv_freq = 1.0 / (10000.0 ** (jnp.arange(0, hs, 2, dtype=jnp.float32) / hs))
    pos = jnp.arange(n_head, dtype=jnp.float32)
    freqs = jnp.outer(pos, inv_freq)                                          # (nh, hs//2)
    cos = jnp.cos(freqs)
    sin = jnp.sin(freqs)

    y = attention(qkv.reshape(bb, t_len, 3 * c), cos, sin,
                  n_head=n_head, out_dtype=x.dtype)                           # (B, T, C)
    x2d = fused_proj_residual(y.reshape(bt, c), params["w_proj"],
                              params["b_proj"], x2d, tm=tm)

    # --- MLP branch: x = x + mlp(rms_norm(x)) ---
    x2d = fused_norm_mlp_residual(x2d, params["w_fc"], params["b_fc"],
                                  params["w_proj2"], params["b_proj2"], tm=tm)
    return x2d.reshape(bb, t_len, c)


# ------------------------- pure-JAX reference check ------------------------ #

def reference_block(x, params, n_head):
    bb, t_len, c = x.shape
    hs = c // n_head

    def rms(v):
        return v * jax.lax.rsqrt(jnp.mean(v * v, axis=-1, keepdims=True) + EPS)

    xn = rms(x)
    qkv = xn @ params["w_attn"] + params["b_attn"][0]
    q, k, v = jnp.split(qkv, 3, axis=-1)
    q = q.reshape(bb, t_len, n_head, hs).transpose(0, 2, 1, 3)
    k = k.reshape(bb, t_len, n_head, hs).transpose(0, 2, 1, 3)
    v = v.reshape(bb, t_len, n_head, hs).transpose(0, 2, 1, 3)

    inv_freq = 1.0 / (10000.0 ** (jnp.arange(0, hs, 2, dtype=jnp.float32) / hs))
    pos = jnp.arange(n_head, dtype=jnp.float32)
    freqs = jnp.outer(pos, inv_freq)
    cos = jnp.cos(freqs)[None, :, None, :]
    sin = jnp.sin(freqs)[None, :, None, :]

    qn, kn = rms(q), rms(k)

    def rot(z):
        d = hs // 2
        z1, z2 = z[..., :d], z[..., d:]
        return jnp.concatenate([z1 * cos + z2 * sin, -z1 * sin + z2 * cos], axis=-1)

    qr, kr = rot(qn), rot(kn)
    s = jnp.einsum("bhqd,bhkd->bhqk", qr, kr) / math.sqrt(hs)
    mask = jnp.tril(jnp.ones((t_len, t_len), dtype=bool))
    s = jnp.where(mask, s, -jnp.inf)
    p = jax.nn.softmax(s, axis=-1)
    y = jnp.einsum("bhqk,bhkd->bhqd", p, v)
    y = y.transpose(0, 2, 1, 3).reshape(bb, t_len, c)
    y = y @ params["w_proj"] + params["b_proj"][0]
    x = x + y

    xn2 = rms(x)
    h = xn2 @ params["w_fc"] + params["b_fc"][0]
    h = jnp.square(jnp.maximum(h, 0.0))
    m = h @ params["w_proj2"] + params["b_proj2"][0]
    return x + m


# ----------------------------------- main ----------------------------------- #

if __name__ == "__main__":
    # small test config consistent with the module: n_embd % n_head == 0
    Bb, T, C, n_head = 2, 16, 64, 4

    key = jax.random.PRNGKey(0)
    ks = jax.random.split(key, 10)
    f32 = jnp.float32
    params = {
        "w_attn":  jax.random.normal(ks[0], (C, 3 * C), f32) * 0.02,   # c_attn.weight^T
        "b_attn":  jax.random.normal(ks[1], (1, 3 * C), f32) * 0.01,   # c_attn.bias
        "w_proj":  jax.random.normal(ks[2], (C, C), f32) * 0.02,       # c_proj.weight^T
        "b_proj":  jax.random.normal(ks[3], (1, C), f32) * 0.01,
        "w_fc":    jax.random.normal(ks[4], (C, 4 * C), f32) * 0.02,   # mlp.c_fc.weight^T
        "b_fc":    jax.random.normal(ks[5], (1, 4 * C), f32) * 0.01,
        "w_proj2": jax.random.normal(ks[6], (4 * C, C), f32) * 0.02,   # mlp.c_proj.weight^T
        "b_proj2": jax.random.normal(ks[7], (1, C), f32) * 0.01,
    }
    x = jax.random.normal(ks[8], (Bb, T, C), f32)

    out = block_forward(x, params, n_head=n_head)
    out = jax.block_until_ready(out)

    ref = reference_block(x, params, n_head)
    assert out.shape == (Bb, T, C)
    assert jnp.allclose(out, ref, rtol=2e-3, atol=2e-3), (
        float(jnp.max(jnp.abs(out - ref))))

    print("KERNEL_OK")
</pallas_src>

<mosaic_0001>
module attributes {stable_mosaic.version = 11 : i64} {
  func.func @_norm_qkv_kernel(%arg0: i32, %arg1: memref<32x64xf32, #tpu.memory_space<vmem>>, %arg2: memref<64x192xf32, #tpu.memory_space<vmem>>, %arg3: memref<1x192xf32, #tpu.memory_space<vmem>>, %arg4: memref<32x192xf32, #tpu.memory_space<vmem>>) attributes {dimension_semantics = [#tpu.dimension_semantics<parallel>], iteration_bounds = array<i64: 1>, scalar_prefetch = 0 : i64, scratch_operands = 0 : i64, tpu.core_type = #tpu.core_type<tc>, window_params = [{transform_indices = @transform_0, window_bounds = array<i64: 32, 64>}, {pipeline_mode = #tpu.pipeline_mode<synchronous>, transform_indices = @transform_1, window_bounds = array<i64: 64, 192>}, {pipeline_mode = #tpu.pipeline_mode<synchronous>, transform_indices = @transform_2, window_bounds = array<i64: 1, 192>}, {transform_indices = @transform_3, window_bounds = array<i64: 32, 192>}]} {
    %c0 = arith.constant 0 : index
    %c0_0 = arith.constant 0 : index
    %0 = vector.load %arg1[%c0, %c0_0] : memref<32x64xf32, #tpu.memory_space<vmem>>, vector<32x64xf32>
    %1 = arith.mulf %0, %0 : vector<32x64xf32>
    %cst = arith.constant dense<0.000000e+00> : vector<32xf32>
    %2 = vector.multi_reduction <add>, %1, %cst [1] : vector<32x64xf32> to vector<32xf32>
    %3 = vector.shape_cast %2 : vector<32xf32> to vector<32x1xf32>
    %cst_1 = arith.constant 6.400000e+01 : f32
    %4 = vector.broadcast %cst_1 : f32 to vector<32x1xf32>
    %5 = arith.divf %3, %4 : vector<32x1xf32>
    %cst_2 = arith.constant 1.1920929E-7 : f32
    %6 = vector.broadcast %cst_2 : f32 to vector<32x1xf32>
    %7 = arith.addf %5, %6 : vector<32x1xf32>
    %8 = math.rsqrt %7 : vector<32x1xf32>
    %9 = vector.broadcast %8 : vector<32x1xf32> to vector<32x64xf32>
    %10 = arith.mulf %0, %9 : vector<32x64xf32>
    %c0_3 = arith.constant 0 : index
    %c0_4 = arith.constant 0 : index
    %11 = vector.load %arg2[%c0_3, %c0_4] : memref<64x192xf32, #tpu.memory_space<vmem>>, vector<64x192xf32>
    %cst_5 = arith.constant dense<0.000000e+00> : vector<32x192xf32>
    %12 = tpu.matmul %10, %11, %cst_5 {dimension_numbers = #tpu.dot_dimension_numbers<[1], [0], [0], [1], [0, 0, 1, 1], [], []>} : vector<32x64xf32>, vector<64x192xf32>, vector<32x192xf32> -> vector<32x192xf32>
    %c0_6 = arith.constant 0 : index
    %c0_7 = arith.constant 0 : index
    %13 = vector.load %arg3[%c0_6, %c0_7] : memref<1x192xf32, #tpu.memory_space<vmem>>, vector<1x192xf32>
    %14 = vector.broadcast %13 : vector<1x192xf32> to vector<32x192xf32>
    %15 = arith.addf %12, %14 : vector<32x192xf32>
    %c0_8 = arith.constant 0 : index
    %c0_9 = arith.constant 0 : index
    %16 = vector.load %arg4[%c0_8, %c0_9] : memref<32x192xf32, #tpu.memory_space<vmem>>, vector<32x192xf32>
    tpu.vector_store %arg4[%c0_8, %c0_9], %15 {strides = array<i32>} : memref<32x192xf32, #tpu.memory_space<vmem>>, vector<32x192xf32>,
    return
  }
  func.func @transform_0(%arg0: i32) -> (i32, i32) {
    %c0_i32 = arith.constant 0 : i32
    %c0_i32_0 = arith.constant 0 : i32
    return %arg0, %c0_i32 : i32, i32
  }
  func.func @transform_1(%arg0: i32) -> (i32, i32) {
    %c0_i32 = arith.constant 0 : i32
    %c0_i32_0 = arith.constant 0 : i32
    %c0_i32_1 = arith.constant 0 : i32
    return %c0_i32, %c0_i32_0 : i32, i32
  }
  func.func @transform_2(%arg0: i32) -> (i32, i32) {
    %c0_i32 = arith.constant 0 : i32
    %c0_i32_0 = arith.constant 0 : i32
    %c0_i32_1 = arith.constant 0 : i32
    return %c0_i32, %c0_i32_0 : i32, i32
  }
  func.func @transform_3(%arg0: i32) -> (i32, i32) {
    %c0_i32 = arith.constant 0 : i32
    %c0_i32_0 = arith.constant 0 : i32
    return %arg0, %c0_i32 : i32, i32
  }
}

module attributes {stable_mosaic.version = 11 : i64} {
  func.func @_attn_kernel(%arg0: i32, %arg1: memref<1x16x192xf32, #tpu.memory_space<vmem>>, %arg2: memref<4x8xf32, #tpu.memory_space<vmem>>, %arg3: memref<4x8xf32, #tpu.memory_space<vmem>>, %arg4: memref<1x16x64xf32, #tpu.memory_space<vmem>>) attributes {dimension_semantics = [#tpu.dimension_semantics<parallel>], iteration_bounds = array<i64: 2>, scalar_prefetch = 0 : i64, scratch_operands = 0 : i64, tpu.core_type = #tpu.core_type<tc>, window_params = [{transform_indices = @transform_0, window_bounds = array<i64: 1, 16, 192>}, {pipeline_mode = #tpu.pipeline_mode<synchronous>, transform_indices = @transform_1, window_bounds = array<i64: 4, 8>}, {pipeline_mode = #tpu.pipeline_mode<synchronous>, transform_indices = @transform_2, window_bounds = array<i64: 4, 8>}, {transform_indices = @transform_3, window_bounds = array<i64: 1, 16, 64>}]} {
    %c0 = arith.constant 0 : index
    %c0_0 = arith.constant 0 : index
    %c0_1 = arith.constant 0 : index
    %0 = vector.load %arg1[%c0, %c0_0, %c0_1] : memref<1x16x192xf32, #tpu.memory_space<vmem>>, vector<1x16x192xf32>
    %1 = vector.shape_cast %0 : vector<1x16x192xf32> to vector<16x192xf32>
    %c0_2 = arith.constant 0 : index
    %c0_3 = arith.constant 0 : index
    %2 = vector.load %arg2[%c0_2, %c0_3] : memref<4x8xf32, #tpu.memory_space<vmem>>, vector<4x8xf32>
    %c0_4 = arith.constant 0 : index
    %c0_5 = arith.constant 0 : index
    %3 = vector.load %arg3[%c0_4, %c0_5] : memref<4x8xf32, #tpu.memory_space<vmem>>, vector<4x8xf32>
    %4 = tpu.iota {dimensions = array<i32: 0>} : vector<16x16xi32>
    %5 = tpu.iota {dimensions = array<i32: 1>} : vector<16x16xi32>
    %6 = arith.cmpi sle, %5, %4 : vector<16x16xi32>
    %7 = vector.extract_strided_slice %1 {offsets = [0, 0], sizes = [16, 16], strides = [1, 1]} : vector<16x192xf32> to vector<16x16xf32>
    %8 = vector.extract_strided_slice %1 {offsets = [0, 64], sizes = [16, 16], strides = [1, 1]} : vector<16x192xf32> to vector<16x16xf32>
    %9 = vector.extract_strided_slice %1 {offsets = [0, 128], sizes = [16, 16], strides = [1, 1]} : vector<16x192xf32> to vector<16x16xf32>
    %10 = arith.mulf %7, %7 : vector<16x16xf32>
    %cst = arith.constant dense<0.000000e+00> : vector<16xf32>
    %11 = vector.multi_reduction <add>, %10, %cst [1] : vector<16x16xf32> to vector<16xf32>
    %12 = vector.shape_cast %11 : vector<16xf32> to vector<16x1xf32>
    %cst_6 = arith.constant 1.600000e+01 : f32
    %13 = vector.broadcast %cst_6 : f32 to vector<16x1xf32>
    %14 = arith.divf %12, %13 : vector<16x1xf32>
    %cst_7 = arith.constant 1.1920929E-7 : f32
    %15 = vector.broadcast %cst_7 : f32 to vector<16x1xf32>
    %16 = arith.addf %14, %15 : vector<16x1xf32>
    %17 = math.rsqrt %16 : vector<16x1xf32>
    %cst_8 = arith.constant 2.500000e-01 : f32
    %18 = vector.broadcast %cst_8 : f32 to vector<16x1xf32>
    %19 = arith.mulf %17, %18 : vector<16x1xf32>
    %20 = vector.broadcast %19 : vector<16x1xf32> to vector<16x16xf32>
    %21 = arith.mulf %7, %20 : vector<16x16xf32>
    %22 = arith.mulf %8, %8 : vector<16x16xf32>
    %cst_9 = arith.constant dense<0.000000e+00> : vector<16xf32>
    %23 = vector.multi_reduction <add>, %22, %cst_9 [1] : vector<16x16xf32> to vector<16xf32>
    %24 = vector.shape_cast %23 : vector<16xf32> to vector<16x1xf32>
    %cst_10 = arith.constant 1.600000e+01 : f32
    %25 = vector.broadcast %cst_10 : f32 to vector<16x1xf32>
    %26 = arith.divf %24, %25 : vector<16x1xf32>
    %cst_11 = arith.constant 1.1920929E-7 : f32
    %27 = vector.broadcast %cst_11 : f32 to vector<16x1xf32>
    %28 = arith.addf %26, %27 : vector<16x1xf32>
    %29 = math.rsqrt %28 : vector<16x1xf32>
    %30 = vector.broadcast %29 : vector<16x1xf32> to vector<16x16xf32>
    %31 = arith.mulf %8, %30 : vector<16x16xf32>
    %32 = vector.extract_strided_slice %2 {offsets = [0, 0], sizes = [1, 8], strides = [1, 1]} : vector<4x8xf32> to vector<1x8xf32>
    %33 = vector.extract_strided_slice %3 {offsets = [0, 0], sizes = [1, 8], strides = [1, 1]} : vector<4x8xf32> to vector<1x8xf32>
    %34 = vector.extract_strided_slice %21 {offsets = [0, 0], sizes = [16, 8], strides = [1, 1]} : vector<16x16xf32> to vector<16x8xf32>
    %35 = vector.extract_strided_slice %21 {offsets = [0, 8], sizes = [16, 8], strides = [1, 1]} : vector<16x16xf32> to vector<16x8xf32>
    %36 = vector.extract_strided_slice %31 {offsets = [0, 0], sizes = [16, 8], strides = [1, 1]} : vector<16x16xf32> to vector<16x8xf32>
    %37 = vector.extract_strided_slice %31 {offsets = [0, 8], sizes = [16, 8], strides = [1, 1]} : vector<16x16xf32> to vector<16x8xf32>
    %38 = vector.broadcast %32 : vector<1x8xf32> to vector<16x8xf32>
    %39 = arith.mulf %34, %38 : vector<16x8xf32>
    %40 = vector.broadcast %33 : vector<1x8xf32> to vector<16x8xf32>
    %41 = arith.mulf %35, %40 : vector<16x8xf32>
    %42 = arith.addf %39, %41 : vector<16x8xf32>
    %43 = vector.broadcast %32 : vector<1x8xf32> to vector<16x8xf32>
    %44 = arith.mulf %35, %43 : vector<16x8xf32>
    %45 = vector.broadcast %33 : vector<1x8xf32> to vector<16x8xf32>
    %46 = arith.mulf %34, %45 : vector<16x8xf32>
    %47 = arith.subf %44, %46 : vector<16x8xf32>
    %48 = vector.broadcast %32 : vector<1x8xf32> to vector<16x8xf32>
    %49 = arith.mulf %36, %48 : vector<16x8xf32>
    %50 = vector.broadcast %33 : vector<1x8xf32> to vector<16x8xf32>
    %51 = arith.mulf %37, %50 : vector<16x8xf32>
    %52 = arith.addf %49, %51 : vector<16x8xf32>
    %53 = vector.broadcast %32 : vector<1x8xf32> to vector<16x8xf32>
    %54 = arith.mulf %37, %53 : vector<16x8xf32>
    %55 = vector.broadcast %33 : vector<1x8xf32> to vector<16x8xf32>
    %56 = arith.mulf %36, %55 : vector<16x8xf32>
    %57 = arith.subf %54, %56 : vector<16x8xf32>
    %58 = tpu.transpose %52, [1, 0] : vector<16x8xf32> -> vector<8x16xf32>
    %cst_12 = arith.constant dense<0.000000e+00> : vector<16x16xf32>
    %59 = tpu.matmul %42, %58, %cst_12 {dimension_numbers = #tpu.dot_dimension_numbers<[1], [0], [0], [1], [0, 0, 1, 1], [], []>} : vector<16x8xf32>, vector<8x16xf32>, vector<16x16xf32> -> vector<16x16xf32>
    %60 = tpu.transpose %57, [1, 0] : vector<16x8xf32> -> vector<8x16xf32>
    %cst_13 = arith.constant dense<0.000000e+00> : vector<16x16xf32>
    %61 = tpu.matmul %47, %60, %cst_13 {dimension_numbers = #tpu.dot_dimension_numbers<[1], [0], [0], [1], [0, 0, 1, 1], [], []>} : vector<16x8xf32>, vector<8x16xf32>, vector<16x16xf32> -> vector<16x16xf32>
    %62 = arith.addf %59, %61 : vector<16x16xf32>
    %cst_14 = arith.constant -1.000000e+30 : f32
    %63 = vector.broadcast %cst_14 : f32 to vector<16x16xf32>
    %64 = arith.select %6, %62, %63 : vector<16x16xi1>, vector<16x16xf32>
    %cst_15 = arith.constant dense<0xFF800000> : vector<16xf32>
    %65 = vector.multi_reduction <maximumf>, %64, %cst_15 [1] : vector<16x16xf32> to vector<16xf32>
    %66 = vector.shape_cast %65 : vector<16xf32> to vector<16x1xf32>
    %67 = vector.broadcast %66 : vector<16x1xf32> to vector<16x16xf32>
    %68 = arith.subf %64, %67 : vector<16x16xf32>
    %69 = math.exp %68 : vector<16x16xf32>
    %cst_16 = arith.constant dense<0.000000e+00> : vector<16xf32>
    %70 = vector.multi_reduction <add>, %69, %cst_16 [1] : vector<16x16xf32> to vector<16xf32>
    %71 = vector.shape_cast %70 : vector<16xf32> to vector<16x1xf32>
    %72 = tpu.reciprocal %71 {approx = true} : vector<16x1xf32> -> vector<16x1xf32>
    %73 = vector.broadcast %72 : vector<16x1xf32> to vector<16x16xf32>
    %74 = arith.mulf %69, %73 : vector<16x16xf32>
    %cst_17 = arith.constant dense<0.000000e+00> : vector<16x16xf32>
    %75 = tpu.matmul %74, %9, %cst_17 {dimension_numbers = #tpu.dot_dimension_numbers<[1], [0], [0], [1], [0, 0, 1, 1], [], []>} : vector<16x16xf32>, vector<16x16xf32>, vector<16x16xf32> -> vector<16x16xf32>
    %c0_18 = arith.constant 0 : index
    %c0_19 = arith.constant 0 : index
    %c0_20 = arith.constant 0 : index
    %76 = vector.load %arg4[%c0_18, %c0_19, %c0_20] : memref<1x16x64xf32, #tpu.memory_space<vmem>>, vector<1x16x16xf32>
    %77 = vector.shape_cast %76 : vector<1x16x16xf32> to vector<16x16xf32>
    %78 = vector.shape_cast %75 : vector<16x16xf32> to vector<1x16x16xf32>
    tpu.vector_store %arg4[%c0_18, %c0_19, %c0_20], %78 {strides = array<i32>} : memref<1x16x64xf32, #tpu.memory_space<vmem>>, vector<1x16x16xf32>,
    %79 = vector.extract_strided_slice %1 {offsets = [0, 16], sizes = [16, 16], strides = [1, 1]} : vector<16x192xf32> to vector<16x16xf32>
    %80 = vector.extract_strided_slice %1 {offsets = [0, 80], sizes = [16, 16], strides = [1, 1]} : vector<16x192xf32> to vector<16x16xf32>
    %81 = vector.extract_strided_slice %1 {offsets = [0, 144], sizes = [16, 16], strides = [1, 1]} : vector<16x192xf32> to vector<16x16xf32>
    %82 = arith.mulf %79, %79 : vector<16x16xf32>
    %cst_21 = arith.constant dense<0.000000e+00> : vector<16xf32>
    %83 = vector.multi_reduction <add>, %82, %cst_21 [1] : vector<16x16xf32> to vector<16xf32>
    %84 = vector.shape_cast %83 : vector<16xf32> to vector<16x1xf32>
    %cst_22 = arith.constant 1.600000e+01 : f32
    %85 = vector.broadcast %cst_22 : f32 to vector<16x1xf32>
    %86 = arith.divf %84, %85 : vector<16x1xf32>
    %cst_23 = arith.constant 1.1920929E-7 : f32
    %87 = vector.broadcast %cst_23 : f32 to vector<16x1xf32>
    %88 = arith.addf %86, %87 : vector<16x1xf32>
    %89 = math.rsqrt %88 : vector<16x1xf32>
    %cst_24 = arith.constant 2.500000e-01 : f32
    %90 = vector.broadcast %cst_24 : f32 to vector<16x1xf32>
    %91 = arith.mulf %89, %90 : vector<16x1xf32>
    %92 = vector.broadcast %91 : vector<16x1xf32> to vector<16x16xf32>
    %93 = arith.mulf %79, %92 : vector<16x16xf32>
    %94 = arith.mulf %80, %80 : vector<16x16xf32>
    %cst_25 = arith.constant dense<0.000000e+00> : vector<16xf32>
    %95 = vector.multi_reduction <add>, %94, %cst_25 [1] : vector<16x16xf32> to vector<16xf32>
    %96 = vector.shape_cast %95 : vector<16xf32> to vector<16x1xf32>
    %cst_26 = arith.constant 1.600000e+01 : f32
    %97 = vector.broadcast %cst_26 : f32 to vector<16x1xf32>
    %98 = arith.divf %96, %97 : vector<16x1xf32>
    %cst_27 = arith.constant 1.1920929E-7 : f32
    %99 = vector.broadcast %cst_27 : f32 to vector<16x1xf32>
    %100 = arith.addf %98, %99 : vector<16x1xf32>
    %101 = math.rsqrt %100 : vector<16x1xf32>
    %102 = vector.broadcast %101 : vector<16x1xf32> to vector<16x16xf32>
    %103 = arith.mulf %80, %102 : vector<16x16xf32>
    %104 = vector.extract_strided_slice %2 {offsets = [1, 0], sizes = [1, 8], strides = [1, 1]} : vector<4x8xf32> to vector<1x8xf32>
    %105 = vector.extract_strided_slice %3 {offsets = [1, 0], sizes = [1, 8], strides = [1, 1]} : vector<4x8xf32> to vector<1x8xf32>
    %106 = vector.extract_strided_slice %93 {offsets = [0, 0], sizes = [16, 8], strides = [1, 1]} : vector<16x16xf32> to vector<16x8xf32>
    %107 = vector.extract_strided_slice %93 {offsets = [0, 8], sizes = [16, 8], strides = [1, 1]} : vector<16x16xf32> to vector<16x8xf32>
    %108 = vector.extract_strided_slice %103 {offsets = [0, 0], sizes = [16, 8], strides = [1, 1]} : vector<16x16xf32> to vector<16x8xf32>
    %109 = vector.extract_strided_slice %103 {offsets = [0, 8], sizes = [16, 8], strides = [1, 1]} : vector<16x16xf32> to vector<16x8xf32>
    %110 = vector.broadcast %104 : vector<1x8xf32> to vector<16x8xf32>
    %111 = arith.mulf %106, %110 : vector<16x8xf32>
    %112 = vector.broadcast %105 : vector<1x8xf32> to vector<16x8xf32>
    %113 = arith.mulf %107, %112 : vector<16x8xf32>
    %114 = arith.addf %111, %113 : vector<16x8xf32>
    %115 = vector.broadcast %104 : vector<1x8xf32> to vector<16x8xf32>
    %116 = arith.mulf %107, %115 : vector<16x8xf32>
    %117 = vector.broadcast %105 : vector<1x8xf32> to vector<16x8xf32>
    %118 = arith.mulf %106, %117 : vector<16x8xf32>
    %119 = arith.subf %116, %118 : vector<16x8xf32>
    %120 = vector.broadcast %104 : vector<1x8xf32> to vector<16x8xf32>
    %121 = arith.mulf %108, %120 : vector<16x8xf32>
    %122 = vector.broadcast %105 : vector<1x8xf32> to vector<16x8xf32>
    %123 = arith.mulf %109, %122 : vector<16x8xf32>
    %124 = arith.addf %121, %123 : vector<16x8xf32>
    %125 = vector.broadcast %104 : vector<1x8xf32> to vector<16x8xf32>
    %126 = arith.mulf %109, %125 : vector<16x8xf32>
    %127 = vector.broadcast %105 : vector<1x8xf32> to vector<16x8xf32>
    %128 = arith.mulf %108, %127 : vector<16x8xf32>
    %129 = arith.subf %126, %128 : vector<16x8xf32>
    %130 = tpu.transpose %124, [1, 0] : vector<16x8xf32> -> vector<8x16xf32>
    %cst_28 = arith.constant dense<0.000000e+00> : vector<16x16xf32>
    %131 = tpu.matmul %114, %130, %cst_28 {dimension_numbers = #tpu.dot_dimension_numbers<[1], [0], [0], [1], [0, 0, 1, 1], [], []>} : vector<16x8xf32>, vector<8x16xf32>, vector<16x16xf32> -> vector<16x16xf32>
    %132 = tpu.transpose %129, [1, 0] : vector<16x8xf32> -> vector<8x16xf32>
    %cst_29 = arith.constant dense<0.000000e+00> : vector<16x16xf32>
    %133 = tpu.matmul %119, %132, %cst_29 {dimension_numbers = #tpu.dot_dimension_numbers<[1], [0], [0], [1], [0, 0, 1, 1], [], []>} : vector<16x8xf32>, vector<8x16xf32>, vector<16x16xf32> -> vector<16x16xf32>
    %134 = arith.addf %131, %133 : vector<16x16xf32>
    %cst_30 = arith.constant -1.000000e+30 : f32
    %135 = vector.broadcast %cst_30 : f32 to vector<16x16xf32>
    %136 = arith.select %6, %134, %135 : vector<16x16xi1>, vector<16x16xf32>
    %cst_31 = arith.constant dense<0xFF800000> : vector<16xf32>
    %137 = vector.multi_reduction <maximumf>, %136, %cst_31 [1] : vector<16x16xf32> to vector<16xf32>
    %138 = vector.shape_cast %137 : vector<16xf32> to vector<16x1xf32>
    %139 = vector.broadcast %138 : vector<16x1xf32> to vector<16x16xf32>
    %140 = arith.subf %136, %139 : vector<16x16xf32>
    %141 = math.exp %140 : vector<16x16xf32>
    %cst_32 = arith.constant dense<0.000000e+00> : vector<16xf32>
    %142 = vector.multi_reduction <add>, %141, %cst_32 [1] : vector<16x16xf32> to vector<16xf32>
    %143 = vector.shape_cast %142 : vector<16xf32> to vector<16x1xf32>
    %144 = tpu.reciprocal %143 {approx = true} : vector<16x1xf32> -> vector<16x1xf32>
    %145 = vector.broadcast %144 : vector<16x1xf32> to vector<16x16xf32>
    %146 = arith.mulf %141, %145 : vector<16x16xf32>
    %cst_33 = arith.constant dense<0.000000e+00> : vector<16x16xf32>
    %147 = tpu.matmul %146, %81, %cst_33 {dimension_numbers = #tpu.dot_dimension_numbers<[1], [0], [0], [1], [0, 0, 1, 1], [], []>} : vector<16x16xf32>, vector<16x16xf32>, vector<16x16xf32> -> vector<16x16xf32>
    %c0_34 = arith.constant 0 : index
    %c0_35 = arith.constant 0 : index
    %c16 = arith.constant 16 : index
    %148 = vector.load %arg4[%c0_34, %c0_35, %c16] : memref<1x16x64xf32, #tpu.memory_space<vmem>>, vector<1x16x16xf32>
    %149 = vector.shape_cast %148 : vector<1x16x16xf32> to vector<16x16xf32>
    %150 = vector.shape_cast %147 : vector<16x16xf32> to vector<1x16x16xf32>
    tpu.vector_store %arg4[%c0_34, %c0_35, %c16], %150 {strides = array<i32>} : memref<1x16x64xf32, #tpu.memory_space<vmem>>, vector<1x16x16xf32>,
    %151 = vector.extract_strided_slice %1 {offsets = [0, 32], sizes = [16, 16], strides = [1, 1]} : vector<16x192xf32> to vector<16x16xf32>
    %152 = vector.extract_strided_slice %1 {offsets = [0, 96], sizes = [16, 16], strides = [1, 1]} : vector<16x192xf32> to vector<16x16xf32>
    %153 = vector.extract_strided_slice %1 {offsets = [0, 160], sizes = [16, 16], strides = [1, 1]} : vector<16x192xf32> to vector<16x16xf32>
    %154 = arith.mulf %151, %151 : vector<16x16xf32>
    %cst_36 = arith.constant dense<0.000000e+00> : vector<16xf32>
    %155 = vector.multi_reduction <add>, %154, %cst_36 [1] : vector<16x16xf32> to vector<16xf32>
    %156 = vector.shape_cast %155 : vector<16xf32> to vector<16x1xf32>
    %cst_37 = arith.constant 1.600000e+01 : f32
    %157 = vector.broadcast %cst_37 : f32 to vector<16x1xf32>
    %158 = arith.divf %156, %157 : vector<16x1xf32>
    %cst_38 = arith.constant 1.1920929E-7 : f32
    %159 = vector.broadcast %cst_38 : f32 to vector<16x1xf32>
    %160 = arith.addf %158, %159 : vector<16x1xf32>
    %161 = math.rsqrt %160 : vector<16x1xf32>
    %cst_39 = arith.constant 2.500000e-01 : f32
    %162 = vector.broadcast %cst_39 : f32 to vector<16x1xf32>
    %163 = arith.mulf %161, %162 : vector<16x1xf32>
    %164 = vector.broadcast %163 : vector<16x1xf32> to vector<16x16xf32>
    %165 = arith.mulf %151, %164 : vector<16x16xf32>
    %166 = arith.mulf %152, %152 : vector<16x16xf32>
    %cst_40 = arith.constant dense<0.000000e+00> : vector<16xf32>
    %167 = vector.multi_reduction <add>, %166, %cst_40 [1] : vector<16x16xf32> to vector<16xf32>
    %168 = vector.shape_cast %167 : vector<16xf32> to vector<16x1xf32>
    %cst_41 = arith.constant 1.600000e+01 : f32
    %169 = vector.broadcast %cst_41 : f32 to vector<16x1xf32>
    %170 = arith.divf %168, %169 : vector<16x1xf32>
    %cst_42 = arith.constant 1.1920929E-7 : f32
    %171 = vector.broadcast %cst_42 : f32 to vector<16x1xf32>
    %172 = arith.addf %170, %171 : vector<16x1xf32>
    %173 = math.rsqrt %172 : vector<16x1xf32>
    %174 = vector.broadcast %173 : vector<16x1xf32> to vector<16x16xf32>
    %175 = arith.mulf %152, %174 : vector<16x16xf32>
    %176 = vector.extract_strided_slice %2 {offsets = [2, 0], sizes = [1, 8], strides = [1, 1]} : vector<4x8xf32> to vector<1x8xf32>
    %177 = vector.extract_strided_slice %3 {offsets = [2, 0], sizes = [1, 8], strides = [1, 1]} : vector<4x8xf32> to vector<1x8xf32>
    %178 = vector.extract_strided_slice %165 {offsets = [0, 0], sizes = [16, 8], strides = [1, 1]} : vector<16x16xf32> to vector<16x8xf32>
    %179 = vector.extract_strided_slice %165 {offsets = [0, 8], sizes = [16, 8], strides = [1, 1]} : vector<16x16xf32> to vector<16x8xf32>
    %180 = vector.extract_strided_slice %175 {offsets = [0, 0], sizes = [16, 8], strides = [1, 1]} : vector<16x16xf32> to vector<16x8xf32>
    %181 = vector.extract_strided_slice %175 {offsets = [0, 8], sizes = [16, 8], strides = [1, 1]} : vector<16x16xf32> to vector<16x8xf32>
    %182 = vector.broadcast %176 : vector<1x8xf32> to vector<16x8xf32>
    %183 = arith.mulf %178, %182 : vector<16x8xf32>
    %184 = vector.broadcast %177 : vector<1x8xf32> to vector<16x8xf32>
    %185 = arith.mulf %179, %184 : vector<16x8xf32>
    %186 = arith.addf %183, %185 : vector<16x8xf32>
    %187 = vector.broadcast %176 : vector<1x8xf32> to vector<16x8xf32>
    %188 = arith.mulf %179, %187 : vector<16x8xf32>
    %189 = vector.broadcast %177 : vector<1x8xf32> to vector<16x8xf32>
    %190 = arith.mulf %178, %189 : vector<16x8xf32>
    %191 = arith.subf %188, %190 : vector<16x8xf32>
    %192 = vector.broadcast %176 : vector<1x8xf32> to vector<16x8xf32>
    %193 = arith.mulf %180, %192 : vector<16x8xf32>
    %194 = vector.broadcast %177 : vector<1x8xf32> to vector<16x8xf32>
    %195 = arith.mulf %181, %194 : vector<16x8xf32>
    %196 = arith.addf %193, %195 : vector<16x8xf32>
    %197 = vector.broadcast %176 : vector<1x8xf32> to vector<16x8xf32>
    %198 = arith.mulf %181, %197 : vector<16x8xf32>
    %199 = vector.broadcast %177 : vector<1x8xf32> to vector<16x8xf32>
    %200 = arith.mulf %180, %199 : vector<16x8xf32>
    %201 = arith.subf %198, %200 : vector<16x8xf32>
    %202 = tpu.transpose %196, [1, 0] : vector<16x8xf32> -> vector<8x16xf32>
    %cst_43 = arith.constant dense<0.000000e+00> : vector<16x16xf32>
    %203 = tpu.matmul %186, %202, %cst_43 {dimension_numbers = #tpu.dot_dimension_numbers<[1], [0], [0], [1], [0, 0, 1, 1], [], []>} : vector<16x8xf32>, vector<8x16xf32>, vector<16x16xf32> -> vector<16x16xf32>
    %204 = tpu.transpose %201, [1, 0] : vector<16x8xf32> -> vector<8x16xf32>
    %cst_44 = arith.constant dense<0.000000e+00> : vector<16x16xf32>
    %205 = tpu.matmul %191, %204, %cst_44 {dimension_numbers = #tpu.dot_dimension_numbers<[1], [0], [0], [1], [0, 0, 1, 1], [], []>} : vector<16x8xf32>, vector<8x16xf32>, vector<16x16xf32> -> vector<16x16xf32>
    %206 = arith.addf %203, %205 : vector<16x16xf32>
    %cst_45 = arith.constant -1.000000e+30 : f32
    %207 = vector.broadcast %cst_45 : f32 to vector<16x16xf32>
    %208 = arith.select %6, %206, %207 : vector<16x16xi1>, vector<16x16xf32>
    %cst_46 = arith.constant dense<0xFF800000> : vector<16xf32>
    %209 = vector.multi_reduction <maximumf>, %208, %cst_46 [1] : vector<16x16xf32> to vector<16xf32>
    %210 = vector.shape_cast %209 : vector<16xf32> to vector<16x1xf32>
    %211 = vector.broadcast %210 : vector<16x1xf32> to vector<16x16xf32>
    %212 = arith.subf %208, %211 : vector<16x16xf32>
    %213 = math.exp %212 : vector<16x16xf32>
    %cst_47 = arith.constant dense<0.000000e+00> : vector<16xf32>
    %214 = vector.multi_reduction <add>, %213, %cst_47 [1] : vector<16x16xf32> to vector<16xf32>
    %215 = vector.shape_cast %214 : vector<16xf32> to vector<16x1xf32>
    %216 = tpu.reciprocal %215 {approx = true} : vector<16x1xf32> -> vector<16x1xf32>
    %217 = vector.broadcast %216 : vector<16x1xf32> to vector<16x16xf32>
    %218 = arith.mulf %213, %217 : vector<16x16xf32>
    %cst_48 = arith.constant dense<0.000000e+00> : vector<16x16xf32>
    %219 = tpu.matmul %218, %153, %cst_48 {dimension_numbers = #tpu.dot_dimension_numbers<[1], [0], [0], [1], [0, 0, 1, 1], [], []>} : vector<16x16xf32>, vector<16x16xf32>, vector<16x16xf32> -> vector<16x16xf32>
    %c0_49 = arith.constant 0 : index
    %c0_50 = arith.constant 0 : index
    %c32 = arith.constant 32 : index
    %220 = vector.load %arg4[%c0_49, %c0_50, %c32] : memref<1x16x64xf32, #tpu.memory_space<vmem>>, vector<1x16x16xf32>
    %221 = vector.shape_cast %220 : vector<1x16x16xf32> to vector<16x16xf32>
    %222 = vector.shape_cast %219 : vector<16x16xf32> to vector<1x16x16xf32>
    tpu.vector_store %arg4[%c0_49, %c0_50, %c32], %222 {strides = array<i32>} : memref<1x16x64xf32, #tpu.memory_space<vmem>>, vector<1x16x16xf32>,
    %223 = vector.extract_strided_slice %1 {offsets = [0, 48], sizes = [16, 16], strides = [1, 1]} : vector<16x192xf32> to vector<16x16xf32>
    %224 = vector.extract_strided_slice %1 {offsets = [0, 112], sizes = [16, 16], strides = [1, 1]} : vector<16x192xf32> to vector<16x16xf32>
    %225 = vector.extract_strided_slice %1 {offsets = [0, 176], sizes = [16, 16], strides = [1, 1]} : vector<16x192xf32> to vector<16x16xf32>
    %226 = arith.mulf %223, %223 : vector<16x16xf32>
    %cst_51 = arith.constant dense<0.000000e+00> : vector<16xf32>
    %227 = vector.multi_reduction <add>, %226, %cst_51 [1] : vector<16x16xf32> to vector<16xf32>
    %228 = vector.shape_cast %227 : vector<16xf32> to vector<16x1xf32>
    %cst_52 = arith.constant 1.600000e+01 : f32
    %229 = vector.broadcast %cst_52 : f32 to vector<16x1xf32>
    %230 = arith.divf %228, %229 : vector<16x1xf32>
    %cst_53 = arith.constant 1.1920929E-7 : f32
    %231 = vector.broadcast %cst_53 : f32 to vector<16x1xf32>
    %232 = arith.addf %230, %231 : vector<16x1xf32>
    %233 = math.rsqrt %232 : vector<16x1xf32>
    %cst_54 = arith.constant 2.500000e-01 : f32
    %234 = vector.broadcast %cst_54 : f32 to vector<16x1xf32>
    %235 = arith.mulf %233, %234 : vector<16x1xf32>
    %236 = vector.broadcast %235 : vector<16x1xf32> to vector<16x16xf32>
    %237 = arith.mulf %223, %236 : vector<16x16xf32>
    %238 = arith.mulf %224, %224 : vector<16x16xf32>
    %cst_55 = arith.constant dense<0.000000e+00> : vector<16xf32>
    %239 = vector.multi_reduction <add>, %238, %cst_55 [1] : vector<16x16xf32> to vector<16xf32>
    %240 = vector.shape_cast %239 : vector<16xf32> to vector<16x1xf32>
    %cst_56 = arith.constant 1.600000e+01 : f32
    %241 = vector.broadcast %cst_56 : f32 to vector<16x1xf32>
    %242 = arith.divf %240, %241 : vector<16x1xf32>
    %cst_57 = arith.constant 1.1920929E-7 : f32
    %243 = vector.broadcast %cst_57 : f32 to vector<16x1xf32>
    %244 = arith.addf %242, %243 : vector<16x1xf32>
    %245 = math.rsqrt %244 : vector<16x1xf32>
    %246 = vector.broadcast %245 : vector<16x1xf32> to vector<16x16xf32>
    %247 = arith.mulf %224, %246 : vector<16x16xf32>
    %248 = vector.extract_strided_slice %2 {offsets = [3, 0], sizes = [1, 8], strides = [1, 1]} : vector<4x8xf32> to vector<1x8xf32>
    %249 = vector.extract_strided_slice %3 {offsets = [3, 0], sizes = [1, 8], strides = [1, 1]} : vector<4x8xf32> to vector<1x8xf32>
    %250 = vector.extract_strided_slice %237 {offsets = [0, 0], sizes = [16, 8], strides = [1, 1]} : vector<16x16xf32> to vector<16x8xf32>
    %251 = vector.extract_strided_slice %237 {offsets = [0, 8], sizes = [16, 8], strides = [1, 1]} : vector<16x16xf32> to vector<16x8xf32>
    %252 = vector.extract_strided_slice %247 {offsets = [0, 0], sizes = [16, 8], strides = [1, 1]} : vector<16x16xf32> to vector<16x8xf32>
    %253 = vector.extract_strided_slice %247 {offsets = [0, 8], sizes = [16, 8], strides = [1, 1]} : vector<16x16xf32> to vector<16x8xf32>
    %254 = vector.broadcast %248 : vector<1x8xf32> to vector<16x8xf32>
    %255 = arith.mulf %250, %254 : vector<16x8xf32>
    %256 = vector.broadcast %249 : vector<1x8xf32> to vector<16x8xf32>
    %257 = arith.mulf %251, %256 : vector<16x8xf32>
    %258 = arith.addf %255, %257 : vector<16x8xf32>
    %259 = vector.broadcast %248 : vector<1x8xf32> to vector<16x8xf32>
    %260 = arith.mulf %251, %259 : vector<16x8xf32>
    %261 = vector.broadcast %249 : vector<1x8xf32> to vector<16x8xf32>
    %262 = arith.mulf %250, %261 : vector<16x8xf32>
    %263 = arith.subf %260, %262 : vector<16x8xf32>
    %264 = vector.broadcast %248 : vector<1x8xf32> to vector<16x8xf32>
    %265 = arith.mulf %252, %264 : vector<16x8xf32>
    %266 = vector.broadcast %249 : vector<1x8xf32> to vector<16x8xf32>
    %267 = arith.mulf %253, %266 : vector<16x8xf32>
    %268 = arith.addf %265, %267 : vector<16x8xf32>
    %269 = vector.broadcast %248 : vector<1x8xf32> to vector<16x8xf32>
    %270 = arith.mulf %253, %269 : vector<16x8xf32>
    %271 = vector.broadcast %249 : vector<1x8xf32> to vector<16x8xf32>
    %272 = arith.mulf %252, %271 : vector<16x8xf32>
    %273 = arith.subf %270, %272 : vector<16x8xf32>
    %274 = tpu.transpose %268, [1, 0] : vector<16x8xf32> -> vector<8x16xf32>
    %cst_58 = arith.constant dense<0.000000e+00> : vector<16x16xf32>
    %275 = tpu.matmul %258, %274, %cst_58 {dimension_numbers = #tpu.dot_dimension_numbers<[1], [0], [0], [1], [0, 0, 1, 1], [], []>} : vector<16x8xf32>, vector<8x16xf32>, vector<16x16xf32> -> vector<16x16xf32>
    %276 = tpu.transpose %273, [1, 0] : vector<16x8xf32> -> vector<8x16xf32>
    %cst_59 = arith.constant dense<0.000000e+00> : vector<16x16xf32>
    %277 = tpu.matmul %263, %276, %cst_59 {dimension_numbers = #tpu.dot_dimension_numbers<[1], [0], [0], [1], [0, 0, 1, 1], [], []>} : vector<16x8xf32>, vector<8x16xf32>, vector<16x16xf32> -> vector<16x16xf32>
    %278 = arith.addf %275, %277 : vector<16x16xf32>
    %cst_60 = arith.constant -1.000000e+30 : f32
    %279 = vector.broadcast %cst_60 : f32 to vector<16x16xf32>
    %280 = arith.select %6, %278, %279 : vector<16x16xi1>, vector<16x16xf32>
    %cst_61 = arith.constant dense<0xFF800000> : vector<16xf32>
    %281 = vector.multi_reduction <maximumf>, %280, %cst_61 [1] : vector<16x16xf32> to vector<16xf32>
    %282 = vector.shape_cast %281 : vector<16xf32> to vector<16x1xf32>
    %283 = vector.broadcast %282 : vector<16x1xf32> to vector<16x16xf32>
    %284 = arith.subf %280, %283 : vector<16x16xf32>
    %285 = math.exp %284 : vector<16x16xf32>
    %cst_62 = arith.constant dense<0.000000e+00> : vector<16xf32>
    %286 = vector.multi_reduction <add>, %285, %cst_62 [1] : vector<16x16xf32> to vector<16xf32>
    %287 = vector.shape_cast %286 : vector<16xf32> to vector<16x1xf32>
    %288 = tpu.reciprocal %287 {approx = true} : vector<16x1xf32> -> vector<16x1xf32>
    %289 = vector.broadcast %288 : vector<16x1xf32> to vector<16x16xf32>
    %290 = arith.mulf %285, %289 : vector<16x16xf32>
    %cst_63 = arith.constant dense<0.000000e+00> : vector<16x16xf32>
    %291 = tpu.matmul %290, %225, %cst_63 {dimension_numbers = #tpu.dot_dimension_numbers<[1], [0], [0], [1], [0, 0, 1, 1], [], []>} : vector<16x16xf32>, vector<16x16xf32>, vector<16x16xf32> -> vector<16x16xf32>
    %c0_64 = arith.constant 0 : index
    %c0_65 = arith.constant 0 : index
    %c48 = arith.constant 48 : index
    %292 = vector.load %arg4[%c0_64, %c0_65, %c48] : memref<1x16x64xf32, #tpu.memory_space<vmem>>, vector<1x16x16xf32>
    %293 = vector.shape_cast %292 : vector<1x16x16xf32> to vector<16x16xf32>
    %294 = vector.shape_cast %291 : vector<16x16xf32> to vector<1x16x16xf32>
    tpu.vector_store %arg4[%c0_64, %c0_65, %c48], %294 {strides = array<i32>} : memref<1x16x64xf32, #tpu.memory_space<vmem>>, vector<1x16x16xf32>,
    return
  }
  func.func @transform_0(%arg0: i32) -> (i32, i32, i32) {
    %c0_i32 = arith.constant 0 : i32
    %c0_i32_0 = arith.constant 0 : i32
    %c0_i32_1 = arith.constant 0 : i32
    return %arg0, %c0_i32, %c0_i32_0 : i32, i32, i32
  }
  func.func @transform_1(%arg0: i32) -> (i32, i32) {
    %c0_i32 = arith.constant 0 : i32
    %c0_i32_0 = arith.constant 0 : i32
    %c0_i32_1 = arith.constant 0 : i32
    return %c0_i32, %c0_i32_0 : i32, i32
  }
  func.func @transform_2(%arg0: i32) -> (i32, i32) {
    %c0_i32 = arith.constant 0 : i32
    %c0_i32_0 = arith.constant 0 : i32
    %c0_i32_1 = arith.constant 0 : i32
    return %c0_i32, %c0_i32_0 : i32, i32
  }
  func.func @transform_3(%arg0: i32) -> (i32, i32, i32) {
    %c0_i32 = arith.constant 0 : i32
    %c0_i32_0 = arith.constant 0 : i32
    %c0_i32_1 = arith.constant 0 : i32
    return %arg0, %c0_i32, %c0_i32_0 : i32, i32, i32
  }
}

module attributes {stable_mosaic.version = 11 : i64} {
  func.func @_proj_add_kernel(%arg0: i32, %arg1: memref<32x64xf32, #tpu.memory_space<vmem>>, %arg2: memref<64x64xf32, #tpu.memory_space<vmem>>, %arg3: memref<1x64xf32, #tpu.memory_space<vmem>>, %arg4: memref<32x64xf32, #tpu.memory_space<vmem>>, %arg5: memref<32x64xf32, #tpu.memory_space<vmem>>) attributes {dimension_semantics = [#tpu.dimension_semantics<parallel>], iteration_bounds = array<i64: 1>, scalar_prefetch = 0 : i64, scratch_operands = 0 : i64, tpu.core_type = #tpu.core_type<tc>, window_params = [{transform_indices = @transform_0, window_bounds = array<i64: 32, 64>}, {pipeline_mode = #tpu.pipeline_mode<synchronous>, transform_indices = @transform_1, window_bounds = array<i64: 64, 64>}, {pipeline_mode = #tpu.pipeline_mode<synchronous>, transform_indices = @transform_2, window_bounds = array<i64: 1, 64>}, {transform_indices = @transform_3, window_bounds = array<i64: 32, 64>}, {transform_indices = @transform_4, window_bounds = array<i64: 32, 64>}]} {
    %c0 = arith.constant 0 : index
    %c0_0 = arith.constant 0 : index
    %0 = vector.load %arg4[%c0, %c0_0] : memref<32x64xf32, #tpu.memory_space<vmem>>, vector<32x64xf32>
    %c0_1 = arith.constant 0 : index
    %c0_2 = arith.constant 0 : index
    %1 = vector.load %arg1[%c0_1, %c0_2] : memref<32x64xf32, #tpu.memory_space<vmem>>, vector<32x64xf32>
    %c0_3 = arith.constant 0 : index
    %c0_4 = arith.constant 0 : index
    %2 = vector.load %arg2[%c0_3, %c0_4] : memref<64x64xf32, #tpu.memory_space<vmem>>, vector<64x64xf32>
    %cst = arith.constant dense<0.000000e+00> : vector<32x64xf32>
    %3 = tpu.matmul %1, %2, %cst {dimension_numbers = #tpu.dot_dimension_numbers<[1], [0], [0], [1], [0, 0, 1, 1], [], []>} : vector<32x64xf32>, vector<64x64xf32>, vector<32x64xf32> -> vector<32x64xf32>
    %4 = arith.addf %0, %3 : vector<32x64xf32>
    %c0_5 = arith.constant 0 : index
    %c0_6 = arith.constant 0 : index
    %5 = vector.load %arg3[%c0_5, %c0_6] : memref<1x64xf32, #tpu.memory_space<vmem>>, vector<1x64xf32>
    %6 = vector.broadcast %5 : vector<1x64xf32> to vector<32x64xf32>
    %7 = arith.addf %4, %6 : vector<32x64xf32>
    %c0_7 = arith.constant 0 : index
    %c0_8 = arith.constant 0 : index
    %8 = vector.load %arg5[%c0_7, %c0_8] : memref<32x64xf32, #tpu.memory_space<vmem>>, vector<32x64xf32>
    tpu.vector_store %arg5[%c0_7, %c0_8], %7 {strides = array<i32>} : memref<32x64xf32, #tpu.memory_space<vmem>>, vector<32x64xf32>,
    return
  }
  func.func @transform_0(%arg0: i32) -> (i32, i32) {
    %c0_i32 = arith.constant 0 : i32
    %c0_i32_0 = arith.constant 0 : i32
    return %arg0, %c0_i32 : i32, i32
  }
  func.func @transform_1(%arg0: i32) -> (i32, i32) {
    %c0_i32 = arith.constant 0 : i32
    %c0_i32_0 = arith.constant 0 : i32
    %c0_i32_1 = arith.constant 0 : i32
    return %c0_i32, %c0_i32_0 : i32, i32
  }
  func.func @transform_2(%arg0: i32) -> (i32, i32) {
    %c0_i32 = arith.constant 0 : i32
    %c0_i32_0 = arith.constant 0 : i32
    %c0_i32_1 = arith.constant 0 : i32
    return %c0_i32, %c0_i32_0 : i32, i32
  }
  func.func @transform_3(%arg0: i32) -> (i32, i32) {
    %c0_i32 = arith.constant 0 : i32
    %c0_i32_0 = arith.constant 0 : i32
    return %arg0, %c0_i32 : i32, i32
  }
  func.func @transform_4(%arg0: i32) -> (i32, i32) {
    %c0_i32 = arith.constant 0 : i32
    %c0_i32_0 = arith.constant 0 : i32
    return %arg0, %c0_i32 : i32, i32
  }
}

module attributes {stable_mosaic.version = 11 : i64} {
  func.func @_norm_mlp_add_kernel(%arg0: i32, %arg1: memref<32x64xf32, #tpu.memory_space<vmem>>, %arg2: memref<64x256xf32, #tpu.memory_space<vmem>>, %arg3: memref<1x256xf32, #tpu.memory_space<vmem>>, %arg4: memref<256x64xf32, #tpu.memory_space<vmem>>, %arg5: memref<1x64xf32, #tpu.memory_space<vmem>>, %arg6: memref<32x64xf32, #tpu.memory_space<vmem>>) attributes {dimension_semantics = [#tpu.dimension_semantics<parallel>], iteration_bounds = array<i64: 1>, scalar_prefetch = 0 : i64, scratch_operands = 0 : i64, tpu.core_type = #tpu.core_type<tc>, window_params = [{transform_indices = @transform_0, window_bounds = array<i64: 32, 64>}, {pipeline_mode = #tpu.pipeline_mode<synchronous>, transform_indices = @transform_1, window_bounds = array<i64: 64, 256>}, {pipeline_mode = #tpu.pipeline_mode<synchronous>, transform_indices = @transform_2, window_bounds = array<i64: 1, 256>}, {pipeline_mode = #tpu.pipeline_mode<synchronous>, transform_indices = @transform_3, window_bounds = array<i64: 256, 64>}, {pipeline_mode = #tpu.pipeline_mode<synchronous>, transform_indices = @transform_4, window_bounds = array<i64: 1, 64>}, {transform_indices = @transform_5, window_bounds = array<i64: 32, 64>}]} {
    %c0 = arith.constant 0 : index
    %c0_0 = arith.constant 0 : index
    %0 = vector.load %arg1[%c0, %c0_0] : memref<32x64xf32, #tpu.memory_space<vmem>>, vector<32x64xf32>
    %1 = arith.mulf %0, %0 : vector<32x64xf32>
    %cst = arith.constant dense<0.000000e+00> : vector<32xf32>
    %2 = vector.multi_reduction <add>, %1, %cst [1] : vector<32x64xf32> to vector<32xf32>
    %3 = vector.shape_cast %2 : vector<32xf32> to vector<32x1xf32>
    %cst_1 = arith.constant 6.400000e+01 : f32
    %4 = vector.broadcast %cst_1 : f32 to vector<32x1xf32>
    %5 = arith.divf %3, %4 : vector<32x1xf32>
    %cst_2 = arith.constant 1.1920929E-7 : f32
    %6 = vector.broadcast %cst_2 : f32 to vector<32x1xf32>
    %7 = arith.addf %5, %6 : vector<32x1xf32>
    %8 = math.rsqrt %7 : vector<32x1xf32>
    %9 = vector.broadcast %8 : vector<32x1xf32> to vector<32x64xf32>
    %10 = arith.mulf %0, %9 : vector<32x64xf32>
    %c0_3 = arith.constant 0 : index
    %c0_4 = arith.constant 0 : index
    %11 = vector.load %arg2[%c0_3, %c0_4] : memref<64x256xf32, #tpu.memory_space<vmem>>, vector<64x256xf32>
    %cst_5 = arith.constant dense<0.000000e+00> : vector<32x256xf32>
    %12 = tpu.matmul %10, %11, %cst_5 {dimension_numbers = #tpu.dot_dimension_numbers<[1], [0], [0], [1], [0, 0, 1, 1], [], []>} : vector<32x64xf32>, vector<64x256xf32>, vector<32x256xf32> -> vector<32x256xf32>
    %c0_6 = arith.constant 0 : index
    %c0_7 = arith.constant 0 : index
    %13 = vector.load %arg3[%c0_6, %c0_7] : memref<1x256xf32, #tpu.memory_space<vmem>>, vector<1x256xf32>
    %14 = vector.broadcast %13 : vector<1x256xf32> to vector<32x256xf32>
    %15 = arith.addf %12, %14 : vector<32x256xf32>
    %cst_8 = arith.constant 0.000000e+00 : f32
    %16 = vector.broadcast %cst_8 : f32 to vector<32x256xf32>
    %17 = arith.maximumf %15, %16 : vector<32x256xf32>
    %18 = arith.mulf %17, %17 : vector<32x256xf32>
    %c0_9 = arith.constant 0 : index
    %c0_10 = arith.constant 0 : index
    %19 = vector.load %arg4[%c0_9, %c0_10] : memref<256x64xf32, #tpu.memory_space<vmem>>, vector<256x64xf32>
    %cst_11 = arith.constant dense<0.000000e+00> : vector<32x64xf32>
    %20 = tpu.matmul %18, %19, %cst_11 {dimension_numbers = #tpu.dot_dimension_numbers<[1], [0], [0], [1], [0, 0, 1, 1], [], []>} : vector<32x256xf32>, vector<256x64xf32>, vector<32x64xf32> -> vector<32x64xf32>
    %21 = arith.addf %0, %20 : vector<32x64xf32>
    %c0_12 = arith.constant 0 : index
    %c0_13 = arith.constant 0 : index
    %22 = vector.load %arg5[%c0_12, %c0_13] : memref<1x64xf32, #tpu.memory_space<vmem>>, vector<1x64xf32>
    %23 = vector.broadcast %22 : vector<1x64xf32> to vector<32x64xf32>
    %24 = arith.addf %21, %23 : vector<32x64xf32>
    %c0_14 = arith.constant 0 : index
    %c0_15 = arith.constant 0 : index
    %25 = vector.load %arg6[%c0_14, %c0_15] : memref<32x64xf32, #tpu.memory_space<vmem>>, vector<32x64xf32>
    tpu.vector_store %arg6[%c0_14, %c0_15], %24 {strides = array<i32>} : memref<32x64xf32, #tpu.memory_space<vmem>>, vector<32x64xf32>,
    return
  }
  func.func @transform_0(%arg0: i32) -> (i32, i32) {
    %c0_i32 = arith.constant 0 : i32
    %c0_i32_0 = arith.constant 0 : i32
    return %arg0, %c0_i32 : i32, i32
  }
  func.func @transform_1(%arg0: i32) -> (i32, i32) {
    %c0_i32 = arith.constant 0 : i32
    %c0_i32_0 = arith.constant 0 : i32
    %c0_i32_1 = arith.constant 0 : i32
    return %c0_i32, %c0_i32_0 : i32, i32
  }
  func.func @transform_2(%arg0: i32) -> (i32, i32) {
    %c0_i32 = arith.constant 0 : i32
    %c0_i32_0 = arith.constant 0 : i32
    %c0_i32_1 = arith.constant 0 : i32
    return %c0_i32, %c0_i32_0 : i32, i32
  }
  func.func @transform_3(%arg0: i32) -> (i32, i32) {
    %c0_i32 = arith.constant 0 : i32
    %c0_i32_0 = arith.constant 0 : i32
    %c0_i32_1 = arith.constant 0 : i32
    return %c0_i32, %c0_i32_0 : i32, i32
  }
  func.func @transform_4(%arg0: i32) -> (i32, i32) {
    %c0_i32 = arith.constant 0 : i32
    %c0_i32_0 = arith.constant 0 : i32
    %c0_i32_1 = arith.constant 0 : i32
    return %c0_i32, %c0_i32_0 : i32, i32
  }
  func.func @transform_5(%arg0: i32) -> (i32, i32) {
    %c0_i32 = arith.constant 0 : i32
    %c0_i32_0 = arith.constant 0 : i32
    return %arg0, %c0_i32 : i32, i32
  }
}

</mosaic_0001>

<bundles_post_ra>
// kernel: block_forward.4
= control target key start
LH: loop header
LB: loop body
LE: loop exit
PB: predicated region body
PF: predicated region fallthrough
CT: control target
= control target key end

     0   :  { %8 = vsyncpa [#allocation3], 0  ;;  %s424_s0 = inlined_call_operand.hbm [shape: f32[32,64], index: 0, kind: input, shape index: {}]   ;;  %s425_s1 = inlined_call_operand.hbm [shape: f32[64,192], index: 1, kind: input, shape index: {}]   ;;  %s426_s2 = inlined_call_operand.vmem [shape: f32[1,192], index: 2, kind: input, shape index: {}]   ;;  %s427_s3 = inlined_call_operand.vmem [shape: f32[32,192], index: 3, kind: output, shape index: {}]  }
   0x1   :  { %9 = vsyncpa [#allocation5], 0  ;;  %s314_s12 = smov [#allocation2]   ;;  %s266_s16 = scalar_lea.hbm %s424_s0, 512 }
   0x2   :  { %s15_s13 = sshll.u32 %s314_s12, 4  ;;  %p267_p0 = scmp.ne.s32.totalorder %s424_s0, %s266_s16  ;;  %s16_s13 = int_to_ptr.vmem [resolvable:$true] %s15_s13 }
   0x3   :  { %p270_p1 = scmp.lt.u32.totalorder %s266_s16, %s424_s0 }
   0x5   :  { %p272_p2 = pnand %p270_p1, %p267_p0 }
   0x7   :  { %275 = shalt.err (!%p272_p2)
}
   0x8   :  { %s276_s21 = scalar_lea.vmem %s16_s13, 512  ;;  %p281_p4 = scmp.lt.s32.totalorder %s16_s13, %s16_s13 }
   0x9   :  { %p277_p3 = scmp.ne.s32.totalorder %s16_s13, %s276_s21  ;;  %p282_p5 = scmp.lt.s32.totalorder %s276_s21, %s276_s21 }
   0xb   :  { %p283_p6 = por %p282_p5, %p281_p4 }
   0xd   :  { %p284_p7 = pnand %p283_p6, %p277_p3 }
   0xf   :  { %287 = shalt.err (!%p284_p7)
}
  0x10   :  { %s315_s22 = smov 128   ;;  %s316_s23 = smov 8  }
  0x11   :  { %21 = dma.hbm_to_vmem [thread:$0]  %s424_s0, 512, %s16_s13, [#allocation3], %s315_s22, %s315_s22, %s316_s23  }
  0x12   :  { %s317_s26 = smov [#allocation4]   ;;  %s288_s30 = scalar_lea.hbm %s425_s1, 2048 }
  0x13   :  { %s27_s27 = sshll.u32 %s317_s26, 4  ;;  %p289_p8 = scmp.ne.s32.totalorder %s425_s1, %s288_s30  ;;  %s28_s27 = int_to_ptr.vmem [resolvable:$true] %s27_s27 }
  0x14   :  { %p292_p9 = scmp.lt.u32.totalorder %s288_s30, %s425_s1 }
  0x16   :  { %p294_p10 = pnand %p292_p9, %p289_p8 }
  0x18   :  { %297 = shalt.err (!%p294_p10)
}
  0x19   :  { %s298_s8 = scalar_lea.vmem %s28_s27, 2048  ;;  %p303_p12 = scmp.lt.s32.totalorder %s28_s27, %s28_s27 }
  0x1a   :  { %p299_p11 = scmp.ne.s32.totalorder %s28_s27, %s298_s8  ;;  %p304_p13 = scmp.lt.s32.totalorder %s298_s8, %s298_s8 }
  0x1c   :  { %p305_p0 = por %p304_p13, %p303_p12 }
  0x1e   :  { %p306_p1 = pnand %p305_p0, %p299_p11 }
  0x20   :  { %309 = shalt.err (!%p306_p1)
}
  0x21   :  { %s318_s0 = smov 256   ;;  %s319_s9 = smov 16  }
  0x22   :  { %33 = dma.hbm_to_vmem [thread:$0]  %s425_s1, 2048, %s28_s27, [#allocation5], %s318_s0, %s318_s0, %s319_s9  }
  0x23   :  { %310 = dma.done.wait [#allocation3], 512  }
  0x24   :  { %311 = vsyncadd [#allocation3], 4294966784 }
  0x25   :  { %312 = dma.done.wait [#allocation5], 2048  }
  0x26   :  { %313 = vsyncadd [#allocation5], 4294965248  ;;  %v365_v0 = vld [vmem:[#allocation2] sm:$0xff]  ;;  %vm50_vm0 = vcmask 523264   ;;  %v367_v1 = vld [vmem:[#allocation2 + $0x8] sm:$0xff]  ;;  %v320_v36 = vmov 0.0   ;;  %v98_v57 = vlaneseq }
  0x27   :  { %v369_v2 = vld [vmem:[#allocation2 + $0x10] sm:$0xff]  ;;  %v46_v3 = vmul.f32 %v365_v0, %v365_v0  ;;  %v47_v4 = vmul.f32 %v367_v1, %v367_v1  ;;  %v377_v6 = vld [vmem:[#allocation2 + $0x18] sm:$0xff]  ;;  %v81_v12 = vld [vmem:[#allocation4 + $0x8] sm:$0xff]  ;;  %184 = vmatprep.mubr.f32.mxu0 %v320_v36  ;;  %196 = vmatprep.mubr.f32.mxu1 %v320_v36 }
  0x28   :  { %v48_v5 = vmul.f32 %v369_v2, %v369_v2  ;;  %v49_v7 = vmul.f32 %v377_v6, %v377_v6  ;;  %v83_v13 = vld [vmem:[#allocation4 + $0x18] sm:$0xff]  ;;  %v80_v15 = vld [vmem:[#allocation4] sm:$0xff]  ;;  %v82_v16 = vld [vmem:[#allocation4 + $0x10] sm:$0xff]  ;;  %v99_v58 = vshrl.u32 %v98_v57, 7 }
  0x29   :  { %v51_v8 = vsel %vm50_vm0, %v46_v3, 0.0  ;;  %v54_v9 = vsel %vm50_vm0, %v47_v4, 0.0  ;;  %v227_v14 = vpack.c.bf16 %v83_v13, %v81_v12  ;;  %v229_v17 = vpack.c.bf16 %v82_v16, %v80_v15  ;;  %v85_v18 = vld [vmem:[#allocation4 + $0x28] sm:$0xff]  ;;  %v87_v19 = vld [vmem:[#allocation4 + $0x38] sm:$0xff]  ;;  %v84_v21 = vld [vmem:[#allocation4 + $0x20] sm:$0xff] }
  0x2a   :  { %52 = vadd.xlane.f32.xlu0 %v51_v8  ;;  %55 = vadd.xlane.f32.xlu1 %v54_v9  ;;  %v57_v10 = vsel %vm50_vm0, %v48_v5, 0.0  ;;  %v60_v11 = vsel %vm50_vm0, %v49_v7, 0.0  ;;  %v231_v20 = vpack.c.bf16 %v87_v19, %v85_v18  ;;  %v86_v22 = vld [vmem:[#allocation4 + $0x30] sm:$0xff]  ;;  %v89_v24 = vld [vmem:[#allocation4 + $0x48] sm:$0xff]  ;;  %v91_v25 = vld [vmem:[#allocation4 + $0x58] sm:$0xff]  ;;  %v100_v59 = vsub.s32 0, %v99_v58 }
  0x2b   :  { %228 = vmatprep.subr.bf16.mxu0 %v227_v14  ;;  %243 = vmatprep.subr.bf16.mxu1 %v227_v14  ;;  %v233_v23 = vpack.c.bf16 %v86_v22, %v84_v21  ;;  %v235_v26 = vpack.c.bf16 %v91_v25, %v89_v24  ;;  %v88_v27 = vld [vmem:[#allocation4 + $0x40] sm:$0xff]  ;;  %v90_v28 = vld [vmem:[#allocation4 + $0x50] sm:$0xff]  ;;  %v93_v30 = vld [vmem:[#allocation4 + $0x68] sm:$0xff]  ;;  %v104_v61 = vsub.s32 1, %v99_v58 }
  0x2c   :  { %230 = vmatpush1.bf16.msra.mxu0 %v229_v17  ;;  %247 = vmatpush1.bf16.msra.mxu1 %v229_v17  ;;  %v237_v29 = vpack.c.bf16 %v90_v28, %v88_v27  ;;  %v95_v31 = vld [vmem:[#allocation4 + $0x78] sm:$0xff]  ;;  %v92_v32 = vld [vmem:[#allocation4 + $0x60] sm:$0xff]  ;;  %v94_v34 = vld [vmem:[#allocation4 + $0x70] sm:$0xff] }
  0x2d   :  { %232 = vmatprep.subr.bf16.mxu0 %v231_v20  ;;  %244 = vmatprep.subr.bf16.mxu1 %v231_v20  ;;  %v239_v33 = vpack.c.bf16 %v95_v31, %v93_v30  ;;  %v241_v35 = vpack.c.bf16 %v94_v34, %v92_v32  ;;  %v96_v60 = vld [vmem:[%s426_s2] sm:$0x3] }
  0x2e   :  { %58 = vadd.xlane.f32.xlu0 %v57_v10  ;;  %61 = vadd.xlane.f32.xlu1 %v60_v11  ;;  %v101_v62 = vrot.slane %v96_v60, %v100_v59  ;;  %v105_v63 = vrot.slane %v96_v60, %v104_v61 }
  0x30   :  { %234 = vmatpush1.bf16.msra.mxu0 %v233_v23  ;;  %248 = vmatpush1.bf16.msra.mxu1 %v233_v23 }
  0x31   :  { %236 = vmatprep.subr.bf16.mxu0 %v235_v26  ;;  %245 = vmatprep.subr.bf16.mxu1 %v235_v26 }
  0x34   :  { %238 = vmatpush1.bf16.msra.mxu0 %v237_v29  ;;  %249 = vmatpush1.bf16.msra.mxu1 %v237_v29 }
  0x35   :  { %240 = vmatprep.subr.bf16.mxu0 %v239_v33  ;;  %246 = vmatprep.subr.bf16.mxu1 %v239_v33 }
  0x38   :  { %242 = vmatpush1.bf16.msra.mxu0 %v241_v35  ;;  %250 = vmatpush1.bf16.msra.mxu1 %v241_v35 }
  0xb7   :  { %v53_v37 = vpop.xlane.xlu0 %52  ;;  %v56_v38 = vpop.xlane.xlu1 %55 }
  0xb8   :  { %v64_v39 = vmul.f32 0.015625, %v53_v37  ;;  %v65_v40 = vmul.f32 0.015625, %v56_v38 }
  0xba   :  { %v68_v41 = vadd.f32 1.1920929e-07, %v64_v39  ;;  %v69_v42 = vadd.f32 1.1920929e-07, %v65_v40 }
  0xbb   :  { %v59_v43 = vpop.xlane.xlu0 %58  ;;  %v62_v44 = vpop.xlane.xlu1 %61 }
  0xbc   :  { %258 = vrsqrt.f32 %v68_v41  ;;  %v66_v45 = vmul.f32 0.015625, %v59_v43  ;;  %v67_v46 = vmul.f32 0.015625, %v62_v44 }
  0xbd   :  { %260 = vrsqrt.f32 %v69_v42 }
  0xbe   :  { %v70_v47 = vadd.f32 1.1920929e-07, %v66_v45  ;;  %v71_v48 = vadd.f32 1.1920929e-07, %v67_v46 }
  0xc0   :  { %262 = vrsqrt.f32 %v70_v47 }
  0xc1   :  { %264 = vrsqrt.f32 %v71_v48 }
  0xc6   :  { %v259_v49 = vpop.eup %258 }
  0xc7   :  { %v261_v50 = vpop.eup %260  ;;  %v76_v51 = vmul.f32 %v259_v49, %v365_v0 }
  0xc8   :  { %v77_v52 = vmul.f32 %v261_v50, %v367_v1 }
  0xc9   :  { %223 = vmatmul.mubr.msk.f32.vlgmr.msra.gmra.mrb[0].mxu0 %vm50_vm0, %v76_v51 }
  0xca   :  { %v263_v53 = vpop.eup %262  ;;  %190 = vmatprep.mubr.f32.mxu0 %v320_v36 }
  0xcb   :  { %v265_v54 = vpop.eup %264  ;;  %v78_v55 = vmul.f32 %v263_v53, %v369_v2 }
  0xcc   :  { %v79_v56 = vmul.f32 %v265_v54, %v377_v6 }
  0xcd   :  { %224 = vmatmul.mubr.msk.f32.gmra.mrb[2].mxu0 %vm50_vm0, %v77_v52  ;;  %225 = vmatmul.mubr.msk.f32.vlgmr.msra.gmra.mrb[0].mxu1 %vm50_vm0, %v78_v55 }
  0xce   :  { %202 = vmatprep.mubr.f32.mxu1 %v320_v36 }
  0xd1   :  { %226 = vmatmul.mubr.msk.f32.gmra.mrb[2].mxu1 %vm50_vm0, %v79_v56 }
 0x19c   :  { %v186_v0 = vpop.f32.mrb[0].mxu0 }
 0x19d   :  { %v187_v1 = vadd.f32 %v186_v0, %v101_v62  ;;  %v188_v2 = vpop.f32.mrb[1].mxu0 }
 0x19e   :  { %v189_v3 = vadd.f32 %v188_v2, %v105_v63 }
 0x19f   :  { %209 = vst [vmem:[%s427_s3] sm:$0xff] %v187_v1 }
 0x1a0   :  { %210 = vst.msk [vmem:[%s427_s3 + $0x8] sm:$0xff] %vm50_vm0, %v189_v3  ;;  %v192_v4 = vpop.f32.mrb[2].mxu0  ;;  %v198_v5 = vpop.f32.mrb[0].mxu1 }
 0x1a1   :  { %v193_v6 = vadd.f32 %v192_v4, %v101_v62  ;;  %v199_v7 = vadd.f32 %v198_v5, %v101_v62  ;;  %v194_v8 = vpop.f32.mrb[3].mxu0  ;;  %v200_v9 = vpop.f32.mrb[1].mxu1 }
 0x1a2   :  { %v195_v10 = vadd.f32 %v194_v8, %v105_v63  ;;  %v201_v11 = vadd.f32 %v200_v9, %v105_v63 }
 0x1a3   :  { %211 = vst [vmem:[%s427_s3 + $0x10] sm:$0xff] %v193_v6  ;;  %213 = vst [vmem:[%s427_s3 + $0x20] sm:$0xff] %v199_v7 }
 0x1a4   :  { %212 = vst.msk [vmem:[%s427_s3 + $0x18] sm:$0xff] %vm50_vm0, %v195_v10  ;;  %214 = vst.msk [vmem:[%s427_s3 + $0x28] sm:$0xff] %vm50_vm0, %v201_v11  ;;  %v204_v12 = vpop.f32.mrb[2].mxu1 }
 0x1a5   :  { %v205_v13 = vadd.f32 %v204_v12, %v101_v62  ;;  %v206_v14 = vpop.f32.mrb[3].mxu1 }
 0x1a6   :  { %v207_v15 = vadd.f32 %v206_v14, %v105_v63 }
 0x1a7   :  { %215 = vst [vmem:[%s427_s3 + $0x30] sm:$0xff] %v205_v13 }
 0x1a8   :  { %216 = vst.msk [vmem:[%s427_s3 + $0x38] sm:$0xff] %vm50_vm0, %v207_v15 }
 0x1a9   :  { %221 = vsyncpa [#allocation3], 1 }
 0x1aa   :  { %222 = vsyncpa [#allocation5], 1 }

// kernel: block_forward.6
= control target key start
LH: loop header
LB: loop body
LE: loop exit
PB: predicated region body
PF: predicated region fallthrough
CT: control target
= control target key end

     0   :  { %vm33_vm0 = vcmask 523264   ;;  %s313_s1 = inlined_call_operand.vmem [shape: f32[64,64], index: 1, kind: input, shape index: {}]   ;;  %s314_s0 = inlined_call_operand.vmem [shape: f32[32,64], index: 0, kind: input, shape index: {}]   ;;  %s315_s3 = inlined_call_operand.vmem [shape: f32[32,64], index: 3, kind: input, shape index: {}]   ;;  %s316_s2 = inlined_call_operand.vmem [shape: f32[1,64], index: 2, kind: input, shape index: {}]   ;;  %s317_s4 = inlined_call_operand.vmem [shape: f32[32,64], index: 4, kind: output, shape index: {}]  }
   0x1   :  { %v25_v0 = vld [vmem:[%s313_s1] sm:$0xff]  ;;  %v26_v1 = vld [vmem:[%s313_s1 + $0x8] sm:$0xff]  ;;  %v27_v2 = vld [vmem:[%s313_s1 + $0x10] sm:$0xff] }
   0x2   :  { %v193_v3 = vpack.c.bf16 %v26_v1, %v25_v0  ;;  %v28_v4 = vld [vmem:[%s313_s1 + $0x18] sm:$0xff]  ;;  %v29_v6 = vld [vmem:[%s313_s1 + $0x20] sm:$0xff]  ;;  %v30_v7 = vld [vmem:[%s313_s1 + $0x28] sm:$0xff] }
   0x3   :  { %v197_v5 = vpack.c.bf16 %v28_v4, %v27_v2  ;;  %v21_v8 = vld [vmem:[%s314_s0] sm:$0xff]  ;;  %v23_v9 = vld [vmem:[%s314_s0 + $0x10] sm:$0xff]  ;;  %v201_v10 = vpack.c.bf16 %v30_v7, %v29_v6  ;;  %v32_v12 = vld [vmem:[%s313_s1 + $0x38] sm:$0xff] }
   0x4   :  { %194 = vmatprep.subr.bf16.mxu0 %v193_v3  ;;  %209 = vmatprep.subr.bf16.mxu1 %v193_v3  ;;  %v31_v11 = vld [vmem:[%s313_s1 + $0x30] sm:$0xff]  ;;  %v22_v14 = vld [vmem:[%s314_s0 + $0x8] sm:$0xff]  ;;  %v24_v15 = vld [vmem:[%s314_s0 + $0x18] sm:$0xff] }
   0x5   :  { %196 = vmatpush3.bf16.msra.mxu0 %v193_v3  ;;  %213 = vmatpush3.bf16.msra.mxu1 %v193_v3  ;;  %v205_v13 = vpack.c.bf16 %v32_v12, %v31_v11  ;;  %v18_v16 = vld [vmem:[%s315_s3 + $0x8] sm:$0xff]  ;;  %v20_v17 = vld [vmem:[%s315_s3 + $0x18] sm:$0xff]  ;;  %v17_v18 = vld [vmem:[%s315_s3] sm:$0xff] }
   0x6   :  { %198 = vmatprep.subr.bf16.mxu0 %v197_v5  ;;  %210 = vmatprep.subr.bf16.mxu1 %v197_v5  ;;  %v19_v19 = vld [vmem:[%s315_s3 + $0x10] sm:$0xff]  ;;  %v158_v21 = vld [vmem:[%s316_s2] ss:$0 sm:$0xff] }
   0x7   :  { %187 = vmatprep.mubr.msk.f32.mxu0 %vm33_vm0, %v21_v8  ;;  %190 = vmatprep.mubr.msk.f32.mxu1 %vm33_vm0, %v23_v9 }
   0x9   :  { %200 = vmatpush3.bf16.msra.mxu0 %v197_v5  ;;  %214 = vmatpush3.bf16.msra.mxu1 %v197_v5 }
   0xa   :  { %202 = vmatprep.subr.bf16.mxu0 %v201_v10  ;;  %211 = vmatprep.subr.bf16.mxu1 %v201_v10 }
   0xd   :  { %204 = vmatpush3.bf16.msra.mxu0 %v201_v10  ;;  %215 = vmatpush3.bf16.msra.mxu1 %v201_v10 }
   0xe   :  { %206 = vmatprep.subr.bf16.mxu0 %v205_v13  ;;  %212 = vmatprep.subr.bf16.mxu1 %v205_v13 }
  0x11   :  { %208 = vmatpush3.bf16.msra.mxu0 %v205_v13  ;;  %216 = vmatpush3.bf16.msra.mxu1 %v205_v13 }
  0x14   :  { %188 = vmatmul.mubr.msk.f32.vlgmr.msra.gmra.mrb[0].mxu0 %vm33_vm0, %v22_v14  ;;  %191 = vmatmul.mubr.msk.f32.vlgmr.msra.gmra.mrb[0].mxu1 %vm33_vm0, %v24_v15 }
  0xe7   :  { %v189_v20 = vpop.f32.mrb[0].mxu0  ;;  %v192_v22 = vpop.f32.mrb[0].mxu1 }
  0xe8   :  { %v132_v23 = vadd.f32 %v189_v20, %v18_v16  ;;  %v134_v24 = vadd.f32 %v192_v22, %v20_v17  ;;  %v112_v25 = vpop.f32.mrb[1].mxu0  ;;  %v122_v26 = vpop.f32.mrb[1].mxu1 }
  0xe9   :  { %v131_v27 = vadd.f32 %v112_v25, %v17_v18  ;;  %v133_v28 = vadd.f32 %v122_v26, %v19_v19 }
  0xea   :  { %v143_v29 = vadd.f32 %v158_v21, %v132_v23  ;;  %v145_v30 = vadd.f32 %v158_v21, %v134_v24 }
  0xeb   :  { %v142_v31 = vadd.f32 %v158_v21, %v131_v27  ;;  %v144_v32 = vadd.f32 %v158_v21, %v133_v28 }
  0xec   :  { %147 = vst.msk [vmem:[%s317_s4 + $0x8] sm:$0xff] %vm33_vm0, %v143_v29  ;;  %149 = vst.msk [vmem:[%s317_s4 + $0x18] sm:$0xff] %vm33_vm0, %v145_v30 }
  0xed   :  { %146 = vst.msk [vmem:[%s317_s4] sm:$0xff] %vm33_vm0, %v142_v31  ;;  %148 = vst.msk [vmem:[%s317_s4 + $0x10] sm:$0xff] %vm33_vm0, %v144_v32 }

// kernel: block_forward.7
= control target key start
LH: loop header
LB: loop body
LE: loop exit
PB: predicated region body
PF: predicated region fallthrough
CT: control target
= control target key end

     0   :  { %vm29_vm0 = vcmask 523264   ;;  %s737_s0 = inlined_call_operand.vmem [shape: f32[32,64], index: 0, kind: input, shape index: {}]   ;;  %s738_s1 = inlined_call_operand.vmem [shape: f32[64,256], index: 1, kind: input, shape index: {}]   ;;  %s739_s2 = inlined_call_operand.vmem [shape: f32[1,256], index: 2, kind: input, shape index: {}]   ;;  %s740_s3 = inlined_call_operand.vmem [shape: f32[256,64], index: 3, kind: input, shape index: {}]   ;;  %s741_s4 = inlined_call_operand.vmem [shape: f32[1,64], index: 4, kind: input, shape index: {}]   ;;  %s742_s5 = inlined_call_operand.hbm [shape: f32[32,64], index: 5, kind: output, shape index: {}]  }
   0x1   :  { %v526_v0 = vld [vmem:[%s737_s0] sm:$0xff]  ;;  %v531_v1 = vld [vmem:[%s737_s0 + $0x8] sm:$0xff]  ;;  %v536_v2 = vld [vmem:[%s737_s0 + $0x10] sm:$0xff] }
   0x2   :  { %v25_v3 = vmul.f32 %v526_v0, %v526_v0  ;;  %v26_v4 = vmul.f32 %v531_v1, %v531_v1  ;;  %v27_v5 = vmul.f32 %v536_v2, %v536_v2  ;;  %v547_v6 = vld [vmem:[%s737_s0 + $0x18] sm:$0xff] }
   0x3   :  { %10 = vsyncpa [#allocation3], 0  ;;  %v28_v7 = vmul.f32 %v547_v6, %v547_v6  ;;  %v60_v12 = vld [vmem:[%s738_s1 + $0x8] sm:$0xff]  ;;  %v62_v13 = vld [vmem:[%s738_s1 + $0x18] sm:$0xff]  ;;  %v489_v35 = vmov 0.0  }
   0x4   :  { %v30_v8 = vsel %vm29_vm0, %v25_v3, 0.0  ;;  %v36_v9 = vsel %vm29_vm0, %v27_v5, 0.0  ;;  %v33_v10 = vsel %vm29_vm0, %v26_v4, 0.0  ;;  %v405_v14 = vpack.c.bf16 %v62_v13, %v60_v12  ;;  %v59_v15 = vld [vmem:[%s738_s1] sm:$0xff]  ;;  %v61_v16 = vld [vmem:[%s738_s1 + $0x10] sm:$0xff]  ;;  %v64_v18 = vld [vmem:[%s738_s1 + $0x28] sm:$0xff]  ;;  %163 = vmatprep.mubr.f32.mxu0 %v489_v35 }
   0x5   :  { %31 = vadd.xlane.f32.xlu0 %v30_v8  ;;  %37 = vadd.xlane.f32.xlu1 %v36_v9  ;;  %v39_v11 = vsel %vm29_vm0, %v28_v7, 0.0  ;;  %v407_v17 = vpack.c.bf16 %v61_v16, %v59_v15  ;;  %v66_v19 = vld [vmem:[%s738_s1 + $0x38] sm:$0xff]  ;;  %v63_v21 = vld [vmem:[%s738_s1 + $0x20] sm:$0xff]  ;;  %v65_v22 = vld [vmem:[%s738_s1 + $0x30] sm:$0xff] }
   0x6   :  { %406 = vmatprep.subr.bf16.mxu0 %v405_v14  ;;  %v409_v20 = vpack.c.bf16 %v66_v19, %v64_v18  ;;  %v411_v23 = vpack.c.bf16 %v65_v22, %v63_v21  ;;  %v68_v24 = vld [vmem:[%s738_s1 + $0x48] sm:$0xff]  ;;  %v70_v25 = vld [vmem:[%s738_s1 + $0x58] sm:$0xff]  ;;  %v67_v27 = vld [vmem:[%s738_s1 + $0x40] sm:$0xff] }
   0x7   :  { %408 = vmatpush1.bf16.msra.mxu0 %v407_v17  ;;  %v413_v26 = vpack.c.bf16 %v70_v25, %v68_v24  ;;  %v69_v28 = vld [vmem:[%s738_s1 + $0x50] sm:$0xff]  ;;  %v72_v30 = vld [vmem:[%s738_s1 + $0x68] sm:$0xff]  ;;  %v74_v31 = vld [vmem:[%s738_s1 + $0x78] sm:$0xff] }
   0x8   :  { %410 = vmatprep.subr.bf16.mxu0 %v409_v20  ;;  %v415_v29 = vpack.c.bf16 %v69_v28, %v67_v27  ;;  %v71_v32 = vld [vmem:[%s738_s1 + $0x60] sm:$0xff]  ;;  %v417_v33 = vpack.c.bf16 %v74_v31, %v72_v30  ;;  %v73_v34 = vld [vmem:[%s738_s1 + $0x70] sm:$0xff]  ;;  %v221_v38 = vld [vmem:[%s740_s3 + $0x88] sm:$0xff] }
   0x9   :  { %34 = vadd.xlane.f32.xlu0 %v33_v10  ;;  %40 = vadd.xlane.f32.xlu1 %v39_v11  ;;  %v419_v36 = vpack.c.bf16 %v73_v34, %v71_v32  ;;  %v220_v37 = vld [vmem:[%s740_s3 + $0x80] sm:$0xff]  ;;  %v205_v41 = vld [vmem:[%s740_s3 + $0x8] sm:$0xff]  ;;  %v222_v42 = vld [vmem:[%s740_s3 + $0x90] sm:$0xff] }
   0xa   :  { %v204_v39 = vld [vmem:[%s740_s3] sm:$0xff]  ;;  %v421_v40 = vpack.c.bf16 %v221_v38, %v220_v37  ;;  %v223_v43 = vld [vmem:[%s740_s3 + $0x98] sm:$0xff]  ;;  %v206_v46 = vld [vmem:[%s740_s3 + $0x10] sm:$0xff] }
   0xb   :  { %412 = vmatpush1.bf16.msra.mxu0 %v411_v23  ;;  %v423_v44 = vpack.c.bf16 %v205_v41, %v204_v39  ;;  %v425_v45 = vpack.c.bf16 %v223_v43, %v222_v42  ;;  %v207_v47 = vld [vmem:[%s740_s3 + $0x18] sm:$0xff]  ;;  %v224_v48 = vld [vmem:[%s740_s3 + $0xa0] sm:$0xff]  ;;  %v225_v49 = vld [vmem:[%s740_s3 + $0xa8] sm:$0xff] }
   0xc   :  { %414 = vmatprep.subr.bf16.mxu0 %v413_v26  ;;  %422 = vmatprep.subr.bf16.mxu1 %v421_v40  ;;  %v427_v50 = vpack.c.bf16 %v207_v47, %v206_v46  ;;  %v429_v51 = vpack.c.bf16 %v225_v49, %v224_v48  ;;  %v208_v52 = vld [vmem:[%s740_s3 + $0x20] sm:$0xff]  ;;  %v209_v53 = vld [vmem:[%s740_s3 + $0x28] sm:$0xff]  ;;  %v226_v54 = vld [vmem:[%s740_s3 + $0xb0] sm:$0xff] }
   0xd   :  { %424 = vmatpush3.bf16.msra.mxu1 %v423_v44  ;;  %v227_v55 = vld [vmem:[%s740_s3 + $0xb8] sm:$0xff]  ;;  %v431_v56 = vpack.c.bf16 %v209_v53, %v208_v52  ;;  %v210_v58 = vld [vmem:[%s740_s3 + $0x30] sm:$0xff]  ;;  %v228_v60 = vld [vmem:[%s740_s3 + $0xc0] sm:$0xff] }
   0xe   :  { %426 = vmatprep.subr.bf16.mxu1 %v425_v45  ;;  %v433_v57 = vpack.c.bf16 %v227_v55, %v226_v54  ;;  %v211_v59 = vld [vmem:[%s740_s3 + $0x38] sm:$0xff]  ;;  %v229_v61 = vld [vmem:[%s740_s3 + $0xc8] sm:$0xff]  ;;  %v212_v3 = vld [vmem:[%s740_s3 + $0x40] sm:$0xff]  ;;  %v77_v45 = vlaneseq }
   0xf   :  { %416 = vmatpush1.bf16.msra.mxu0 %v415_v29  ;;  %v435_v62 = vpack.c.bf16 %v211_v59, %v210_v58  ;;  %v437_v63 = vpack.c.bf16 %v229_v61, %v228_v60  ;;  %v213_v4 = vld [vmem:[%s740_s3 + $0x48] sm:$0xff]  ;;  %v230_v5 = vld [vmem:[%s740_s3 + $0xd0] sm:$0xff]  ;;  %v231_v7 = vld [vmem:[%s740_s3 + $0xd8] sm:$0xff] }
  0x10   :  { %418 = vmatprep.subr.bf16.mxu0 %v417_v33  ;;  %v439_v8 = vpack.c.bf16 %v213_v4, %v212_v3  ;;  %v441_v9 = vpack.c.bf16 %v231_v7, %v230_v5  ;;  %v214_v10 = vld [vmem:[%s740_s3 + $0x50] sm:$0xff]  ;;  %v215_v11 = vld [vmem:[%s740_s3 + $0x58] sm:$0xff]  ;;  %v232_v33 = vld [vmem:[%s740_s3 + $0xe0] sm:$0xff]  ;;  %v78_v46 = vshrl.u32 %v77_v45, 7 }
  0x11   :  { %428 = vmatpush3.bf16.msra.mxu1 %v427_v50  ;;  %v443_v12 = vpack.c.bf16 %v215_v11, %v214_v10  ;;  %v233_v34 = vld [vmem:[%s740_s3 + $0xe8] sm:$0xff]  ;;  %v216_v37 = vld [vmem:[%s740_s3 + $0x60] sm:$0xff]  ;;  %v234_v39 = vld [vmem:[%s740_s3 + $0xf0] sm:$0xff] }
  0x12   :  { %430 = vmatprep.subr.bf16.mxu1 %v429_v51  ;;  %v217_v38 = vld [vmem:[%s740_s3 + $0x68] sm:$0xff]  ;;  %v235_v40 = vld [vmem:[%s740_s3 + $0xf8] sm:$0xff]  ;;  %v218_v42 = vld [vmem:[%s740_s3 + $0x70] sm:$0xff]  ;;  %v79_v47 = vsub.s32 0, %v78_v46  ;;  %v83_v49 = vsub.s32 1, %v78_v46 }
  0x13   :  { %420 = vmatpush1.bf16.msra.mxu0 %v419_v36  ;;  %v445_v36 = vpack.c.bf16 %v233_v34, %v232_v33  ;;  %v449_v41 = vpack.c.bf16 %v235_v40, %v234_v39  ;;  %v219_v43 = vld [vmem:[%s740_s3 + $0x78] sm:$0xff]  ;;  %v75_v48 = vld [vmem:[%s739_s2] sm:$0x3] }
  0x14   :  { %v451_v44 = vpack.c.bf16 %v219_v43, %v218_v42  ;;  %v80_v50 = vrot.slane %v75_v48, %v79_v47  ;;  %v84_v51 = vrot.slane %v75_v48, %v83_v49 }
  0x15   :  { %432 = vmatpush3.bf16.msra.mxu1 %v431_v56 }
  0x16   :  { %434 = vmatprep.subr.bf16.mxu1 %v433_v57 }
  0x19   :  { %436 = vmatpush3.bf16.msra.mxu1 %v435_v62 }
  0x1a   :  { %438 = vmatprep.subr.bf16.mxu1 %v437_v63 }
  0x1d   :  { %440 = vmatpush3.bf16.msra.mxu1 %v439_v8 }
  0x1e   :  { %442 = vmatprep.subr.bf16.mxu1 %v441_v9 }
  0x21   :  { %444 = vmatpush3.bf16.msra.mxu1 %v443_v12 }
  0x22   :  { %446 = vmatprep.subr.bf16.mxu1 %v445_v36 }
  0x92   :  { %v32_v13 = vpop.xlane.xlu0 %31  ;;  %v38_v14 = vpop.xlane.xlu1 %37 }
  0x93   :  { %v43_v15 = vmul.f32 0.015625, %v32_v13  ;;  %v45_v16 = vmul.f32 0.015625, %v38_v14 }
  0x95   :  { %v47_v17 = vadd.f32 1.1920929e-07, %v43_v15  ;;  %v49_v19 = vadd.f32 1.1920929e-07, %v45_v16 }
  0x96   :  { %v35_v18 = vpop.xlane.xlu0 %34  ;;  %v41_v20 = vpop.xlane.xlu1 %40 }
  0x97   :  { %457 = vrsqrt.f32 %v47_v17  ;;  %v44_v21 = vmul.f32 0.015625, %v35_v18  ;;  %v46_v22 = vmul.f32 0.015625, %v41_v20 }
  0x98   :  { %459 = vrsqrt.f32 %v49_v19 }
  0x99   :  { %v48_v23 = vadd.f32 1.1920929e-07, %v44_v21  ;;  %v50_v24 = vadd.f32 1.1920929e-07, %v46_v22 }
  0x9b   :  { %461 = vrsqrt.f32 %v48_v23 }
  0x9c   :  { %463 = vrsqrt.f32 %v50_v24 }
  0xa1   :  { %v458_v25 = vpop.eup %457 }
  0xa2   :  { %v55_v26 = vmul.f32 %v458_v25, %v526_v0  ;;  %v460_v27 = vpop.eup %459 }
  0xa3   :  { %v57_v30 = vmul.f32 %v460_v27, %v536_v2  ;;  %v360_v27 = vld [vmem:[%s741_s4] ss:$0 sm:$0xff]  ;;  %s490_s4 = smov [#allocation2]  }
  0xa4   :  { %356 = vmatmul.mubr.msk.f32.vlgmr.msra.gmra.mrb[0].mxu0 %vm29_vm0, %v55_v26  ;;  %s345_s17 = sshll.u32 %s490_s4, 4  ;;  %s346_s17 = int_to_ptr.vmem [resolvable:$true] %s345_s17 }
  0xa5   :  { %v462_v28 = vpop.eup %461  ;;  %169 = vmatprep.mubr.f32.mxu0 %v489_v35  ;;  %s465_s18 = scalar_lea.vmem %s346_s17, 512  ;;  %p470_p1 = scmp.lt.s32.totalorder %s346_s17, %s346_s17 }
  0xa6   :  { %v56_v29 = vmul.f32 %v462_v28, %v531_v1  ;;  %v464_v31 = vpop.eup %463  ;;  %p466_p0 = scmp.ne.s32.totalorder %s346_s17, %s465_s18  ;;  %p471_p2 = scmp.lt.s32.totalorder %s465_s18, %s465_s18 }
  0xa7   :  { %v58_v32 = vmul.f32 %v464_v31, %v547_v6 }
  0xa8   :  { %357 = vmatmul.mubr.msk.f32.gmra.mrb[2].mxu0 %vm29_vm0, %v56_v29  ;;  %p472_p3 = por %p471_p2, %p470_p1 }
  0xa9   :  { %175 = vmatprep.mubr.f32.mxu0 %v489_v35 }
  0xaa   :  { %p473_p4 = pnand %p472_p3, %p466_p0 }
  0xac   :  { %358 = vmatmul.mubr.msk.f32.gmra.mrb[4].mxu0 %vm29_vm0, %v57_v30 }
  0xad   :  { %181 = vmatprep.mubr.f32.mxu0 %v489_v35  ;;  %v447_v35 = vpack.c.bf16 %v217_v38, %v216_v37 }
  0xaf   :  { %448 = vmatpush3.bf16.msra.mxu1 %v447_v35 }
  0xb0   :  { %359 = vmatmul.mubr.msk.f32.gmra.mrb[6].mxu0 %vm29_vm0, %v58_v32  ;;  %450 = vmatprep.subr.bf16.mxu1 %v449_v41 }
  0xb3   :  { %452 = vmatpush3.bf16.msra.mxu1 %v451_v44 }
 0x177   :  { %v165_v52 = vpop.f32.mrb[0].mxu0 }
 0x178   :  { %v166_v53 = vadd.f32 %v165_v52, %v80_v50  ;;  %v167_v54 = vpop.f32.mrb[1].mxu0 }
 0x179   :  { %v168_v55 = vadd.f32 %v167_v54, %v84_v51 }
 0x17a   :  { %v188_v56 = vmax.f32 %v166_v53, 0.0 }
 0x17b   :  { %v171_v57 = vpop.f32.mrb[2].mxu0  ;;  %v189_v58 = vmax.f32 %v168_v55, 0.0 }
 0x17c   :  { %v172_v59 = vadd.f32 %v171_v57, %v80_v50  ;;  %v173_v60 = vpop.f32.mrb[3].mxu0  ;;  %v196_v63 = vmul.f32 %v188_v56, %v188_v56 }
 0x17d   :  { %v174_v61 = vadd.f32 %v173_v60, %v84_v51  ;;  %v197_v62 = vmul.f32 %v189_v58, %v189_v58 }
 0x17e   :  { %v190_v3 = vmax.f32 %v172_v59, 0.0 }
 0x17f   :  { %v191_v4 = vmax.f32 %v174_v61, 0.0  ;;  %v177_v5 = vpop.f32.mrb[4].mxu0  ;;  %300 = vmatprep.mubr.f32.mxu1 %v197_v62 }
 0x180   :  { %v178_v7 = vadd.f32 %v177_v5, %v80_v50  ;;  %v179_v8 = vpop.f32.mrb[5].mxu0  ;;  %301 = vmatmul.mubr.f32.vlgmr.msra.gmra.mrb[0].mxu1 %v196_v63  ;;  %v198_v11 = vmul.f32 %v190_v3, %v190_v3 }
 0x181   :  { %v199_v9 = vmul.f32 %v191_v4, %v191_v4  ;;  %v180_v10 = vadd.f32 %v179_v8, %v84_v51 }
 0x182   :  { %v192_v12 = vmax.f32 %v178_v7, 0.0 }
 0x183   :  { %v193_v13 = vmax.f32 %v180_v10, 0.0  ;;  %v183_v14 = vpop.f32.mrb[6].mxu0  ;;  %305 = vmatprep.mubr.f32.mxu1 %v199_v9 }
 0x184   :  { %v184_v15 = vadd.f32 %v183_v14, %v80_v50  ;;  %v185_v16 = vpop.f32.mrb[7].mxu0  ;;  %306 = vmatmul.mubr.f32.gmra.mrb[2].mxu1 %v198_v11  ;;  %v200_v19 = vmul.f32 %v192_v12, %v192_v12 }
 0x185   :  { %v201_v17 = vmul.f32 %v193_v13, %v193_v13  ;;  %v186_v18 = vadd.f32 %v185_v16, %v84_v51 }
 0x186   :  { %v194_v20 = vmax.f32 %v184_v15, 0.0 }
 0x187   :  { %v195_v21 = vmax.f32 %v186_v18, 0.0  ;;  %310 = vmatprep.mubr.f32.mxu1 %v201_v17 }
 0x188   :  { %311 = vmatmul.mubr.f32.gmra.mrb[4].mxu1 %v200_v19  ;;  %v202_v23 = vmul.f32 %v194_v20, %v194_v20 }
 0x189   :  { %v203_v22 = vmul.f32 %v195_v21, %v195_v21 }
 0x18b   :  { %315 = vmatprep.mubr.f32.mxu1 %v203_v22 }
 0x18c   :  { %316 = vmatmul.mubr.f32.gmra.mrb[6].mxu1 %v202_v23 }
 0x253   :  { %v393_v24 = vpop.f32.mrb[0].mxu1 }
 0x254   :  { %v394_v25 = vpop.f32.mrb[1].mxu1 }
 0x255   :  { %v395_v26 = vadd.f32 %v394_v25, %v393_v24 }
 0x257   :  { %v321_v28 = vadd.f32 %v395_v26, %v526_v0  ;;  %v396_v29 = vpop.f32.mrb[2].mxu1 }
 0x258   :  { %v397_v30 = vpop.f32.mrb[3].mxu1 }
 0x259   :  { %v332_v31 = vadd.f32 %v360_v27, %v321_v28  ;;  %v398_v32 = vadd.f32 %v397_v30, %v396_v29 }
 0x25b   :  { %336 = vst.msk [vmem:[#allocation2] sm:$0xff] %vm29_vm0, %v332_v31  ;;  %v322_v33 = vadd.f32 %v398_v32, %v531_v1  ;;  %v399_v34 = vpop.f32.mrb[4].mxu1 }
 0x25c   :  { %v400_v36 = vpop.f32.mrb[5].mxu1 }
 0x25d   :  { %v333_v37 = vadd.f32 %v360_v27, %v322_v33  ;;  %v401_v38 = vadd.f32 %v400_v36, %v399_v34 }
 0x25f   :  { %337 = vst.msk [vmem:[#allocation2 + $0x8] sm:$0xff] %vm29_vm0, %v333_v37  ;;  %v323_v35 = vadd.f32 %v401_v38, %v536_v2  ;;  %v402_v39 = vpop.f32.mrb[6].mxu1 }
 0x260   :  { %v403_v40 = vpop.f32.mrb[7].mxu1 }
 0x261   :  { %v334_v41 = vadd.f32 %v360_v27, %v323_v35  ;;  %v404_v0 = vadd.f32 %v403_v40, %v402_v39 }
 0x263   :  { %338 = vst.msk [vmem:[#allocation2 + $0x10] sm:$0xff] %vm29_vm0, %v334_v41  ;;  %v324_v42 = vadd.f32 %v404_v0, %v547_v6 }
 0x265   :  { %v335_v1 = vadd.f32 %v360_v27, %v324_v42 }
 0x267   :  { %339 = vst.msk [vmem:[#allocation2 + $0x18] sm:$0xff] %vm29_vm0, %v335_v1 }
 0x268   :  { %476 = shalt.err (!%p473_p4)
}
 0x269   :  { %s477_s21 = scalar_lea.hbm %s742_s5, 512 }
 0x26a   :  { %p478_p5 = scmp.ne.s32.totalorder %s742_s5, %s477_s21  ;;  %p481_p6 = scmp.lt.u32.totalorder %s477_s21, %s742_s5 }
 0x26c   :  { %p483_p7 = pnand %p481_p6, %p478_p5 }
 0x26e   :  { %486 = shalt.err (!%p483_p7)
}
 0x26f   :  { %s491_s26 = smov 128   ;;  %s492_s27 = smov 8  }
 0x270   :  { %351 = dma.vmem_to_hbm [thread:$0]  %s346_s17, 512, %s742_s5, [#allocation3], %s491_s26, %s491_s26, %s492_s27  }
 0x271   :  { %487 = dma.done.wait [#allocation3], 512  }
 0x272   :  { %488 = vsyncadd [#allocation3], 4294966784 }
 0x273   :  { %355 = vsyncpa [#allocation3], 1 }

// kernel: block_forward.5
= control target key start
LH: loop header
LB: loop body
LE: loop exit
PB: predicated region body
PF: predicated region fallthrough
CT: control target
= control target key end

     0   :  { %s2437_s12 = smov 0   ;;  %s2882_s0 = inlined_call_operand.vmem [shape: f32[2,16,192], index: 0, kind: input, shape index: {}]   ;;  %s2883_s1 = inlined_call_operand.vmem [shape: f32[4,8], index: 1, kind: input, shape index: {}]   ;;  %s2884_s2 = inlined_call_operand.vmem [shape: f32[4,8], index: 2, kind: input, shape index: {}]   ;;  %s2885_s3 = inlined_call_operand.vmem [shape: f32[2,16,64], index: 3, kind: output, shape index: {}]  }
   0x1 LB: > { %s1993_s13 = sadd.s32 4294967295, %s2400_s12   ;;  %p1997_p0 = scmp.ge.s32.totalorder %s2400_s12, 1  ;;  %s2400_s12 = sphi %s2437_s12, %s13_s12  }
   0x2   : > { %p137_p1 = scmp.lt.s32.totalorder %s2400_s12, 3 }
   0x4   : > { %p138_p2 = pnand %p1997_p0, %p137_p1 }
   0x5   : > { %p161_p3 = scmp.lt.s32.totalorder (!%p138_p2), %s1993_s13, 1  ;;  %vm186_vm0 = vcmask (!%p138_p2), 130048   ;;  %s2402_s18 = smov (!%p138_p2), 64   ;;  %v177_v10 = vlaneseq (!%p138_p2)  ;;  %v2484_v13 = vld [vmem:[%s2884_s2] sm:$0xf] (!%p138_p2)  ;;  %vm322_vm1 = vcmask (!%p138_p2), 64512  }
   0x6   : > { %141 = sbr.rel (%p138_p2) target bundleno = 3336 (0xd08), region = 32  ;;  %v2491_v15 = vld [vmem:[%s2883_s1] sm:$0xf] (!%p138_p2)  ;;  %s2403_s23 = smov (!%p138_p2), 72   ;;  %vm2540_vm2 = vmpackc.low (!%p138_p2), %vm322_vm1, %vm322_vm1  ;;  %vm1047_vm5 = vcmask (!%p138_p2), 261248   ;;  %vm1491_vm6 = vcmask (!%p138_p2), 392448  }
   0x7   : > { %v2478_v11 = vshrl.u32 (!%p138_p2), %v177_v10, 7  ;;  %s2404_s24 = smov (!%p138_p2), 8   ;;  %s2405_s25 = smov (!%p138_p2), 120   ;;  %vm1935_vm7 = vcmask (!%p138_p2), 523648  }
   0x8   : > { %s2406_s26 = smov (!%p138_p2), 56   ;;  %s2407_s27 = smov (!%p138_p2), 48  }
   0x9   : > { %v228_v12 = vsub.s32 (!%p138_p2), 0, %v2478_v11  ;;  %s2408_s28 = smov (!%p138_p2), 112   ;;  %s2409_s29 = smov (!%p138_p2), 80  }
   0xa   : > { %s2410_s30 = smov (!%p138_p2), 16   ;;  %s2411_s4 = smov (!%p138_p2), 24  }
   0xb   : > { %v235_v14 = vrot.slane (!%p138_p2), %v2484_v13, %v228_v12  ;;  %v2495_v16 = vrot.slane (!%p138_p2), %v2491_v15, %v228_v12  ;;  %s2412_s5 = smov (!%p138_p2), 88   ;;  %s2413_s6 = smov (!%p138_p2), 40  }
   0xc   : > { %s2414_s7 = smov (!%p138_p2), 104   ;;  %s2415_s8 = smov (!%p138_p2), 32  }
   0xd   : > { %s2889_s13 = smov (!%p161_p3, %s1993_s13), 1  ;;  %s2416_s9 = smov 96  }
   0xe   : > { %s2044_s14 = sshll.u32 %s2889_s13, 5  ;;  %s2045_s10 = sshll.u32 %s2889_s13, 4 }
   0xf   : > { %s2451_s17 = scalar_lea.vmem %s2882_s0, %s2044_s14  ;;  %s2698_s15 = scalar_lea.vmem %s2885_s3, %s2045_s10 }
  0x10   : > { %v2454_v0 = vld [vmem:[%s2451_s17] sm:$0xff]  ;;  %v2457_v1 = vld [vmem:[%s2451_s17 + $0x10] sm:$0xff] }
  0x11   : > { %v2461_v2 = vmul.f32 %v2454_v0, %v2454_v0  ;;  %v2465_v3 = vmul.f32 %v2457_v1, %v2457_v1 }
  0x13   : > { %206 = vrot.lane.b32.xlu0 %v2461_v2, %s2402_s18  ;;  %v190_v4 = vsel %vm186_vm0, %v2465_v3, 0.0  ;;  %v187_v5 = vsel %vm186_vm0, %v2461_v2, 0.0 }
  0x14   : > { %191 = vadd.xlane.f32.xlu1 %v190_v4 }
  0x17   : > { %208 = vrot.lane.b32.xlu0 %v2465_v3, %s2402_s18 }
  0x36   : > { %188 = vadd.xlane.f32.xlu0 %v187_v5 }
  0x85   : > { %v207_v6 = vpop.permute.xlu0 %206 }
  0x86   : > { %v212_v7 = vsel %vm186_vm0, %v207_v6, 0.0 }
  0x87   : > { %213 = vadd.xlane.f32.xlu1 %v212_v7 }
  0x89   : > { %v209_v8 = vpop.permute.xlu0 %208 }
  0x8a   : > { %v215_v9 = vsel %vm186_vm0, %v209_v8, 0.0 }
  0x8b   : > { %216 = vadd.xlane.f32.xlu1 %v215_v9 }
  0x9c   : > { %295 = vrot.lane.b32.xlu1 %v235_v14, %s2402_s18 }
  0xa0   : > { %275 = vrot.lane.b32.xlu1 %v235_v14, %s2403_s23 }
  0xa1   : > { %v192_v17 = vpop.xlane.xlu1 %191 }
  0xa2   : > { %v195_v18 = vmul.f32 0.0625, %v192_v17 }
  0xa4   : > { %290 = vrot.lane.b32.xlu1 %v2495_v16, %s2403_s23  ;;  %v197_v19 = vadd.f32 1.1920929e-07, %v195_v18 }
  0xa6   : > { %2328 = vrsqrt.f32 %v197_v19 }
  0xb0   : > { %v2329_v29 = vpop.eup %2328 }
  0xb1   : > { %v201_v33 = vmul.f32 0.25, %v2329_v29 }
  0xb3   : > { %v2503_v37 = vmul.f32 %v201_v33, %v2457_v1 }
  0xb5   : > { %v259_v40 = vmul.f32 %v235_v14, %v2503_v37  ;;  %v231_v33 = vmul.f32 %v2495_v16, %v2503_v37 }
  0xc3   : > { %v189_v24 = vpop.xlane.xlu0 %188 }
  0xc4   : > { %v194_v27 = vmul.f32 0.0625, %v189_v24 }
  0xc6   : > { %v196_v28 = vadd.f32 1.1920929e-07, %v194_v27 }
 0x114   : > { %v214_v20 = vpop.xlane.xlu1 %213 }
 0x115   : > { %v218_v21 = vmul.f32 0.0625, %v214_v20 }
 0x117   : > { %v220_v22 = vadd.f32 1.1920929e-07, %v218_v21 }
 0x118   : > { %v217_v23 = vpop.xlane.xlu1 %216 }
 0x119   : > { %2330 = vrsqrt.f32 %v220_v22  ;;  %v219_v25 = vmul.f32 0.0625, %v217_v23 }
 0x11b   : > { %v221_v26 = vadd.f32 1.1920929e-07, %v219_v25 }
 0x11c   : > { %v296_v32 = vpop.permute.xlu1 %295 }
 0x11d   : > { %2332 = vrsqrt.f32 %v221_v26 }
 0x11e   : > { %2334 = vrsqrt.f32 %v196_v28 }
 0x120   : > { %v276_v42 = vpop.permute.xlu1 %275 }
 0x123   : > { %v2331_v30 = vpop.eup %2330 }
 0x124   : > { %v224_v31 = vmul.f32 %v2331_v30, %v2454_v0  ;;  %v291_v47 = vpop.permute.xlu1 %290 }
 0x126   : > { %v298_v34 = vmul.f32 %v296_v32, %v224_v31  ;;  %v278_v43 = vmul.f32 %v276_v42, %v224_v31  ;;  %v293_v49 = vmul.f32 %v291_v47, %v224_v31 }
 0x127   : > { %v2333_v35 = vpop.eup %2332 }
 0x128   : > { %v225_v36 = vmul.f32 %v2333_v35, %v2457_v1  ;;  %302 = vrot.lane.b32.xlu1 %v298_v34, %s2404_s24  ;;  %v2335_v39 = vpop.eup %2334 }
 0x129   : > { %v200_v41 = vmul.f32 0.25, %v2335_v39 }
 0x12a   : > { %v299_v38 = vmul.f32 %v296_v32, %v225_v36  ;;  %v279_v45 = vmul.f32 %v276_v42, %v225_v36  ;;  %v294_v50 = vmul.f32 %v291_v47, %v225_v36 }
 0x12b   : > { %v2513_v44 = vmul.f32 %v200_v41, %v2454_v0 }
 0x12c   : > { %270 = vrot.lane.b32.xlu1 %v2495_v16, %s2402_s18  ;;  %304 = vrot.lane.b32.xlu0 %v299_v38, %s2404_s24 }
 0x12d   : > { %v258_v46 = vmul.f32 %v235_v14, %v2513_v44  ;;  %v230_v29 = vmul.f32 %v2495_v16, %v2513_v44 }
 0x130   : > { %253 = vrot.lane.b32.xlu1 %v2495_v16, %s2404_s24  ;;  %264 = vrot.lane.b32.xlu0 %v259_v40, %s2404_s24 }
 0x134   : > { %282 = vrot.lane.b32.xlu1 %v278_v43, %s2405_s25 }
 0x138   : > { %284 = vrot.lane.b32.xlu1 %v279_v45, %s2405_s25 }
 0x13c   : > { %262 = vrot.lane.b32.xlu1 %v258_v46, %s2404_s24 }
 0x140   : > { %237 = vrot.lane.b32.xlu1 %v235_v14, %s2404_s24 }
 0x19a   : > { %v303_v48 = vpop.permute.xlu1 %302 }
 0x19b   : > { %v308_v53 = vsub.f32 %v293_v49, %v303_v48 }
 0x19e   : > { %v271_v51 = vpop.permute.xlu1 %270  ;;  %v305_v52 = vpop.permute.xlu0 %304 }
 0x19f   : > { %v309_v54 = vsub.f32 %v294_v50, %v305_v52  ;;  %v273_v58 = vmul.f32 %v271_v51, %v224_v31  ;;  %v274_v59 = vmul.f32 %v271_v51, %v225_v36 }
 0x1a1   : > { %v2273_v55 = vpack.i.bf16 %v309_v54, %v308_v53  ;;  %v2582_v53 = vadd.s32 8, %v2478_v11  ;;  %v2585_v54 = vand.u32 127, %v177_v10 }
 0x1a2   : > { %v254_v56 = vpop.permute.xlu1 %253  ;;  %v265_v8 = vpop.permute.xlu0 %264 }
 0x1a3   : > { %2274 = vrot.lane.b32.xlu0 %v2273_v55, %s2406_s26  ;;  %v256_v63 = vmul.f32 %v254_v56, %v2513_v44  ;;  %v257_v4 = vmul.f32 %v254_v56, %v2503_v37  ;;  %vm183_vm3 = vcmp.le.s32.totalorder %v2585_v54, %v2582_v53  ;;  %vm182_vm4 = vcmp.le.s32.totalorder %v2585_v54, %v2478_v11 }
 0x1a5   : > { %v269_v9 = vsub.f32 %v257_v4, %v265_v8 }
 0x1a6   : > { %v283_v57 = vpop.permute.xlu1 %282 }
 0x1a7   : > { %v288_v61 = vadd.f32 %v283_v57, %v273_v58 }
 0x1aa   : > { %v285_v60 = vpop.permute.xlu1 %284 }
 0x1ab   : > { %v289_v62 = vadd.f32 %v285_v60, %v274_v59 }
 0x1ad   : > { %v2278_v5 = vpack.i.bf16 %v289_v62, %v288_v61 }
 0x1ae   : > { %v263_v6 = vpop.permute.xlu1 %262 }
 0x1af   : > { %v268_v7 = vsub.f32 %v256_v63, %v263_v6  ;;  %2279 = vrot.lane.b32.xlu1 %v2278_v5, %s2402_s18 }
 0x1b1   : > { %312 = vrot.lane.b32.xlu0 %v268_v7, %s2405_s25 }
 0x1b2   : > { %v238_v12 = vpop.permute.xlu1 %237 }
 0x1b3   : > { %v240_v14 = vmul.f32 %v238_v12, %v2513_v44  ;;  %314 = vrot.lane.b32.xlu1 %v269_v9, %s2405_s25  ;;  %v241_v17 = vmul.f32 %v238_v12, %v2503_v37  ;;  %v648_v37 = vsub.s32 1, %v2478_v11 }
 0x1b5   : > { %244 = vrot.lane.b32.xlu0 %v240_v14, %s2405_s25  ;;  %v659_v43 = vrot.slane %v2484_v13, %v648_v37  ;;  %v2570_v44 = vrot.slane %v2491_v15, %v648_v37 }
 0x1b7   : > { %246 = vrot.lane.b32.xlu1 %v241_v17, %s2405_s25 }
 0x1b9   : > { %626 = vrot.lane.b32.xlu0 %v2461_v2, %s2407_s27 }
 0x1bb   : > { %628 = vrot.lane.b32.xlu1 %v2465_v3, %s2407_s27 }
 0x1bd   : > { %604 = vrot.lane.b32.xlu0 %v2461_v2, %s2408_s28 }
 0x1bf   : > { %606 = vrot.lane.b32.xlu1 %v2465_v3, %s2408_s28 }
 0x215   : > { %v2275_v18 = vpop.permute.xlu0 %2274 }
 0x216   : > { %v2277_v19 = vunpack.i.h.bf16 %v2275_v18  ;;  %v2276_v20 = vunpack.i.l.bf16 %v2275_v18 }
 0x218   : > { %v2178_v22 = vpack.c.bf16 %v2277_v19, %v2276_v20 }
 0x21a   : > { %2180 = vmatprep.subr.msk.bf16.mxu0 %vm2540_vm2, %v2178_v22 }
 0x21b   : > { %2183 = vmatpush3.bf16.xpose.msk.msra.mxu0 %vm2540_vm2, %v2178_v22 }
 0x221   : > { %v2280_v23 = vpop.permute.xlu1 %2279 }
 0x222   : > { %v2282_v24 = vunpack.i.h.bf16 %v2280_v23  ;;  %v2281_v25 = vunpack.i.l.bf16 %v2280_v23 }
 0x223   : > { %v313_v26 = vpop.permute.xlu0 %312 }
 0x224   : > { %v2184_v27 = vpack.c.bf16 %v2282_v24, %v2281_v25  ;;  %2098 = vmatprep.mubr.msk.f32.mxu0 %vm322_vm1, %v313_v26 }
 0x225   : > { %v315_v28 = vpop.permute.xlu1 %314 }
 0x226   : > { %2099 = vmatmul.mubr.msk.f32.vlgmr.msra.gmra.mrb[0].mxu0 %vm322_vm1, %v315_v28  ;;  %2186 = vmatprep.subr.msk.bf16.mxu0 %vm2540_vm2, %v2184_v27 }
 0x227   : > { %v245_v30 = vpop.permute.xlu0 %244  ;;  %2189 = vmatpush3.bf16.xpose.msk.msra.mxu0 %vm2540_vm2, %v2184_v27 }
 0x228   : > { %v250_v31 = vadd.f32 %v245_v30, %v230_v29 }
 0x229   : > { %v247_v32 = vpop.permute.xlu1 %246 }
 0x22a   : > { %2105 = vmatprep.mubr.msk.f32.mxu0 %vm322_vm1, %v250_v31  ;;  %v251_v35 = vadd.f32 %v247_v32, %v231_v33 }
 0x22b   : > { %v627_v34 = vpop.permute.xlu0 %626 }
 0x22c   : > { %v632_v36 = vsel %vm186_vm0, %v627_v34, 0.0 }
 0x22d   : > { %633 = vadd.xlane.f32.xlu0 %v632_v36  ;;  %v629_v38 = vpop.permute.xlu1 %628 }
 0x22e   : > { %2106 = vmatmul.mubr.msk.f32.vlgmr.msra.gmra.mrb[0].mxu0 %vm322_vm1, %v251_v35  ;;  %v635_v39 = vsel %vm186_vm0, %v629_v38, 0.0 }
 0x22f   : > { %636 = vadd.xlane.f32.xlu1 %v635_v39  ;;  %v605_v40 = vpop.permute.xlu0 %604 }
 0x230   : > { %v610_v41 = vsel %vm186_vm0, %v605_v40, 0.0 }
 0x231   : > { %611 = vadd.xlane.f32.xlu0 %v610_v41  ;;  %v607_v42 = vpop.permute.xlu1 %606 }
 0x232   : > { %v613_v16 = vsel %vm186_vm0, %v607_v42, 0.0 }
 0x235   : > { %614 = vadd.xlane.f32.xlu0 %v613_v16 }
 0x240   : > { %721 = vrot.lane.b32.xlu1 %v659_v43, %s2409_s29 }
 0x244   : > { %681 = vrot.lane.b32.xlu1 %v659_v43, %s2410_s30 }
 0x248   : > { %661 = vrot.lane.b32.xlu1 %v659_v43, %s2411_s4 }
 0x24c   : > { %716 = vrot.lane.b32.xlu1 %v2570_v44, %s2412_s5 }
 0x2ba   : > { %v634_v45 = vpop.xlane.xlu0 %633 }
 0x2bb   : > { %v638_v46 = vmul.f32 0.0625, %v634_v45 }
 0x2bc   : > { %v637_v48 = vpop.xlane.xlu1 %636 }
 0x2bd   : > { %v640_v47 = vadd.f32 1.1920929e-07, %v638_v46  ;;  %v639_v10 = vmul.f32 0.0625, %v637_v48  ;;  %v2637_v48 = vld [vmem:[%s2451_s17 + $0x18] sm:$0xff] }
 0x2be   : > { %v612_v5 = vpop.xlane.xlu0 %611 }
 0x2bf   : > { %2336 = vrsqrt.f32 %v640_v47  ;;  %v641_v61 = vadd.f32 1.1920929e-07, %v639_v10  ;;  %v616_v8 = vmul.f32 0.0625, %v612_v5  ;;  %v2634_v47 = vld [vmem:[%s2451_s17 + $0x8] sm:$0xff] }
 0x2c0   : > { %v722_v50 = vpop.permute.xlu1 %721 }
 0x2c1   : > { %2338 = vrsqrt.f32 %v641_v61  ;;  %v618_v12 = vadd.f32 1.1920929e-07, %v616_v8 }
 0x2c2   : > { %v615_v6 = vpop.xlane.xlu0 %614 }
 0x2c3   : > { %v617_v7 = vmul.f32 0.0625, %v615_v6 }
 0x2c4   : > { %v682_v28 = vpop.permute.xlu1 %681 }
 0x2c5   : > { %v619_v9 = vadd.f32 1.1920929e-07, %v617_v7 }
 0x2c7   : > { %2340 = vrsqrt.f32 %v619_v9 }
 0x2c8   : > { %2342 = vrsqrt.f32 %v618_v12  ;;  %v662_v31 = vpop.permute.xlu1 %661 }
 0x2c9   : > { %v2337_v49 = vpop.eup %2336 }
 0x2ca   : > { %v2575_v51 = vmul.f32 %v2337_v49, %v2454_v0 }
 0x2cb   : > { %v2339_v62 = vpop.eup %2338 }
 0x2cc   : > { %v724_v52 = vmul.f32 %v722_v50, %v2575_v51  ;;  %v2600_v63 = vmul.f32 %v2339_v62, %v2457_v1  ;;  %v717_v16 = vpop.permute.xlu1 %716 }
 0x2ce   : > { %728 = vrot.lane.b32.xlu1 %v724_v52, %s2404_s24  ;;  %v725_v4 = vmul.f32 %v722_v50, %v2600_v63  ;;  %v2190_v50 = vpack.c.bf16 %v2637_v48, %v2634_v47 }
 0x2d0   : > { %2191 = vmatprep.subr.bf16.mxu1 %v2190_v50 }
 0x2d1   : > { %v2341_v14 = vpop.eup %2340  ;;  %2193 = vmatpush3.bf16.msra.mxu1 %v2190_v50 }
 0x2d2   : > { %696 = vrot.lane.b32.xlu1 %v2570_v44, %s2409_s29  ;;  %v2343_v18 = vpop.eup %2342  ;;  %v623_v19 = vmul.f32 0.25, %v2341_v14 }
 0x2d3   : > { %v622_v22 = vmul.f32 0.25, %v2343_v18 }
 0x2d4   : > { %v2608_v23 = vmul.f32 %v623_v19, %v2457_v1 }
 0x2d5   : > { %v624_v25 = vmul.f32 %v622_v22, %v2454_v0 }
 0x2d6   : > { %v685_v29 = vmul.f32 %v682_v28, %v2608_v23  ;;  %v665_v33 = vmul.f32 %v662_v31, %v2608_v23 }
 0x2d7   : > { %v684_v30 = vmul.f32 %v682_v28, %v624_v25  ;;  %v664_v32 = vmul.f32 %v662_v31, %v624_v25 }
 0x301   : > { %v2107_v55 = vpop.f32.mrb[0].mxu0 }
 0x302   : > { %v498_v56 = vsel %vm183_vm3, %v2107_v55, -1e+30  ;;  %v488_v57 = vpop.f32.mrb[1].mxu0 }
 0x303   : > { %v502_v58 = vsel %vm186_vm0, %v498_v56, -inf  ;;  %v497_v59 = vsel %vm182_vm4, %v488_v57, -1e+30 }
 0x304   : > { %503 = vmax.xlane.f32.xlu0 %v502_v58  ;;  %v499_v60 = vsel %vm186_vm0, %v497_v59, -inf }
 0x308   : > { %500 = vmax.xlane.f32.xlu0 %v499_v60 }
 0x31e   : > { %701 = vrot.lane.b32.xlu0 %v659_v43, %s2412_s5  ;;  %v719_v43 = vmul.f32 %v717_v16, %v2575_v51 }
 0x322   : > { %730 = vrot.lane.b32.xlu0 %v725_v4, %s2404_s24 }
 0x326   : > { %676 = vrot.lane.b32.xlu0 %v2570_v44, %s2411_s4 }
 0x340   : > { %v729_v46 = vpop.permute.xlu1 %728 }
 0x341   : > { %v734_v49 = vsub.f32 %v719_v43, %v729_v46 }
 0x344   : > { %v697_v55 = vpop.permute.xlu1 %696 }
 0x345   : > { %v699_v57 = vmul.f32 %v697_v55, %v2575_v51  ;;  %v700_v58 = vmul.f32 %v697_v55, %v2600_v63 }
 0x391   : > { %v504_v17 = vpop.xlane.xlu0 %503 }
 0x392   : > { %v506_v36 = vsub.f32 %v498_v56, %v504_v17 }
 0x394   : > { %v509_v38 = vmul.f32 1.442695, %v506_v36 }
 0x395   : > { %v501_v20 = vpop.xlane.xlu0 %500 }
 0x396   : > { %v505_v34 = vsub.f32 %v497_v59, %v501_v20 }
 0x398   : > { %v507_v35 = vmul.f32 1.442695, %v505_v34 }
 0x399   : > { %v702_v24 = vpop.permute.xlu0 %701 }
 0x39a   : > { %v704_v26 = vmul.f32 %v702_v24, %v2575_v51  ;;  %v705_v27 = vmul.f32 %v702_v24, %v2600_v63  ;;  %2344 = vpow2.f32 %v507_v35 }
 0x39b   : > { %2346 = vpow2.f32 %v509_v38 }
 0x39c   : > { %710 = vrot.lane.b32.xlu0 %v705_v27, %s2405_s25  ;;  %708 = vrot.lane.b32.xlu1 %v704_v26, %s2405_s25 }
 0x39d   : > { %v731_v37 = vpop.permute.xlu0 %730 }
 0x3a0   : > { %690 = vrot.lane.b32.xlu0 %v685_v29, %s2404_s24  ;;  %688 = vrot.lane.b32.xlu1 %v684_v30, %s2404_s24 }
 0x3a1   : > { %v677_v56 = vpop.permute.xlu0 %676 }
 0x3a2   : > { %v679_v62 = vmul.f32 %v677_v56, %v624_v25  ;;  %v680_v7 = vmul.f32 %v677_v56, %v2608_v23 }
 0x3a4   : > { %668 = vrot.lane.b32.xlu0 %v664_v32, %s2405_s25  ;;  %651 = vrot.lane.b32.xlu1 %v2570_v44, %s2410_s30  ;;  %v2623_v39 = vpop.eup %2344  ;;  %v720_v44 = vmul.f32 %v717_v16, %v2600_v63 }
 0x3a5   : > { %v511_v40 = vsel %vm186_vm0, %v2623_v39, 0.0  ;;  %v2627_v41 = vpop.eup %2346 }
 0x3a6   : > { %v514_v42 = vsel %vm186_vm0, %v2627_v41, 0.0  ;;  %v735_v45 = vsub.f32 %v720_v44, %v731_v37  ;;  %v1094_v37 = vsub.s32 2, %v2478_v11 }
 0x3a8   : > { %670 = vrot.lane.b32.xlu1 %v665_v33, %s2405_s25  ;;  %v2283_v52 = vpack.i.bf16 %v735_v45, %v734_v49  ;;  %v1105_v43 = vrot.slane %v2484_v13, %v1094_v37  ;;  %v2683_v44 = vrot.slane %v2491_v15, %v1094_v37  ;;  %v2740_v37 = vpack.i.bf16 %v2637_v48, %v2634_v47 }
 0x3c3   : > { %512 = vadd.xlane.f32.xlu0 %v511_v40 }
 0x3cc   : > { %515 = vadd.xlane.f32.xlu1 %v514_v42 }
 0x3d9   : > { %2284 = vrot.lane.b32.xlu0 %v2283_v52, %s2413_s6 }
 0x40e   : > { %v709_v59 = vpop.permute.xlu1 %708  ;;  %v711_v10 = vpop.permute.xlu0 %710 }
 0x40f   : > { %v714_v60 = vadd.f32 %v709_v59, %v699_v57  ;;  %v715_v61 = vadd.f32 %v711_v10, %v700_v58 }
 0x411   : > { %v2288_v4 = vpack.i.bf16 %v715_v61, %v714_v60 }
 0x412   : > { %v689_v5 = vpop.permute.xlu1 %688  ;;  %v691_v6 = vpop.permute.xlu0 %690 }
 0x413   : > { %v694_v8 = vsub.f32 %v679_v62, %v689_v5  ;;  %2289 = vrot.lane.b32.xlu1 %v2288_v4, %s2407_s27  ;;  %v695_v9 = vsub.f32 %v680_v7, %v691_v6 }
 0x415   : > { %738 = vrot.lane.b32.xlu0 %v694_v8, %s2414_s7 }
 0x416   : > { %v652_v51 = vpop.permute.xlu1 %651  ;;  %v669_v63 = vpop.permute.xlu0 %668 }
 0x417   : > { %v654_v12 = vmul.f32 %v652_v51, %v624_v25  ;;  %740 = vrot.lane.b32.xlu1 %v695_v9, %s2414_s7  ;;  %v655_v14 = vmul.f32 %v652_v51, %v2608_v23 }
 0x419   : > { %v674_v17 = vadd.f32 %v669_v63, %v654_v12 }
 0x41a   : > { %v671_v18 = vpop.permute.xlu1 %670 }
 0x41b   : > { %v675_v19 = vadd.f32 %v671_v18, %v655_v14  ;;  %833 = vrot.lane.b32.xlu0 %v674_v17, %s2408_s28 }
 0x41d   : > { %835 = vrot.lane.b32.xlu1 %v675_v19, %s2408_s28 }
 0x41f   : > { %1072 = vrot.lane.b32.xlu0 %v2461_v2, %s2415_s8 }
 0x421   : > { %1074 = vrot.lane.b32.xlu1 %v2465_v3, %s2415_s8 }
 0x423   : > { %1050 = vrot.lane.b32.xlu0 %v2461_v2, %s2416_s9 }
 0x425   : > { %1052 = vrot.lane.b32.xlu1 %v2465_v3, %s2416_s9 }
 0x450   : > { %v513_v20 = vpop.xlane.xlu0 %512 }
 0x451   : > { %2348 = vrcp.f32 %v513_v20 }
 0x454   : > { %v2285_v22 = vpop.permute.xlu0 %2284 }
 0x455   : > { %v2287_v23 = vunpack.i.h.bf16 %v2285_v22  ;;  %v2286_v24 = vunpack.i.l.bf16 %v2285_v22 }
 0x457   : > { %v2194_v25 = vpack.c.bf16 %v2287_v23, %v2286_v24 }
 0x459   : > { %v516_v26 = vpop.xlane.xlu1 %515  ;;  %2196 = vmatprep.subr.msk.bf16.mxu1 %vm2540_vm2, %v2194_v25 }
 0x45a   : > { %2350 = vrcp.f32 %v516_v26 }
 0x45b   : > { %v2349_v27 = vpop.eup %2348 }
 0x45c   : > { %v519_v28 = vmul.f32 %v2349_v27, %v2623_v39 }
 0x45e   : > { %2112 = vmatprep.mubr.msk.f32.mxu1 %vm186_vm0, %v519_v28 }
 0x464   : > { %v2351_v29 = vpop.eup %2350 }
 0x465   : > { %v520_v30 = vmul.f32 %v2351_v29, %v2627_v41 }
 0x467   : > { %2113 = vmatmul.mubr.msk.f32.vlgmr.msra.gmra.mrb[0].mxu1 %vm186_vm0, %v520_v30 }
 0x468   : > { %2199 = vmatpush3.bf16.xpose.msk.msra.mxu1 %vm2540_vm2, %v2194_v25 }
 0x485   : > { %v2290_v31 = vpop.permute.xlu1 %2289 }
 0x486   : > { %v2292_v32 = vunpack.i.h.bf16 %v2290_v31  ;;  %v2291_v33 = vunpack.i.l.bf16 %v2290_v31 }
 0x487   : > { %v739_v34 = vpop.permute.xlu0 %738 }
 0x488   : > { %v2200_v35 = vpack.c.bf16 %v2292_v32, %v2291_v33  ;;  %2119 = vmatprep.mubr.msk.f32.mxu1 %vm322_vm1, %v739_v34 }
 0x489   : > { %v741_v36 = vpop.permute.xlu1 %740 }
 0x48a   : > { %2120 = vmatmul.mubr.msk.f32.vlgmr.msra.gmra.mrb[2].mxu1 %vm322_vm1, %v741_v36  ;;  %2202 = vmatprep.subr.msk.bf16.mxu1 %vm2540_vm2, %v2200_v35 }
 0x48b   : > { %2205 = vmatpush3.bf16.xpose.msk.msra.mxu1 %vm2540_vm2, %v2200_v35 }
 0x48d   : > { %v834_v38 = vpop.permute.xlu0 %833 }
 0x48e   : > { %2126 = vmatprep.mubr.msk.f32.mxu1 %vm322_vm1, %v834_v38 }
 0x48f   : > { %v836_v39 = vpop.permute.xlu1 %835 }
 0x491   : > { %v1073_v40 = vpop.permute.xlu0 %1072 }
 0x492   : > { %2127 = vmatmul.mubr.msk.f32.vlgmr.msra.gmra.mrb[2].mxu1 %vm322_vm1, %v836_v39  ;;  %v1078_v41 = vsel %vm186_vm0, %v1073_v40, 0.0 }
 0x493   : > { %1079 = vadd.xlane.f32.xlu0 %v1078_v41  ;;  %v1075_v42 = vpop.permute.xlu1 %1074 }
 0x494   : > { %v1081_v16 = vsel %vm186_vm0, %v1075_v42, 0.0 }
 0x495   : > { %1082 = vadd.xlane.f32.xlu1 %v1081_v16  ;;  %v1051_v45 = vpop.permute.xlu0 %1050 }
 0x496   : > { %v1056_v46 = vsel %vm186_vm0, %v1051_v45, 0.0 }
 0x497   : > { %v1053_v49 = vpop.permute.xlu1 %1052  ;;  %1057 = vadd.xlane.f32.xlu0 %v1056_v46 }
 0x498   : > { %v1059_v50 = vsel %vm186_vm0, %v1053_v49, 0.0 }
 0x49b   : > { %1060 = vadd.xlane.f32.xlu0 %v1059_v50 }
 0x4a6   : > { %1167 = vrot.lane.b32.xlu1 %v1105_v43, %s2416_s9 }
 0x4aa   : > { %1127 = vrot.lane.b32.xlu1 %v1105_v43, %s2415_s8 }
 0x4ae   : > { %1107 = vrot.lane.b32.xlu1 %v1105_v43, %s2413_s6 }
 0x4b2   : > { %1162 = vrot.lane.b32.xlu1 %v2683_v44, %s2414_s7 }
 0x520   : > { %v1080_v52 = vpop.xlane.xlu0 %1079 }
 0x521   : > { %v1084_v55 = vmul.f32 0.0625, %v1080_v52 }
 0x522   : > { %v1083_v57 = vpop.xlane.xlu1 %1082 }
 0x523   : > { %v1086_v56 = vadd.f32 1.1920929e-07, %v1084_v55  ;;  %v1085_v9 = vmul.f32 0.0625, %v1083_v57 }
 0x524   : > { %v1058_v18 = vpop.xlane.xlu0 %1057 }
 0x525   : > { %2352 = vrsqrt.f32 %v1086_v56  ;;  %v1087_v12 = vadd.f32 1.1920929e-07, %v1085_v9  ;;  %v1062_v22 = vmul.f32 0.0625, %v1058_v18 }
 0x526   : > { %v1168_v59 = vpop.permute.xlu1 %1167 }
 0x527   : > { %2354 = vrsqrt.f32 %v1087_v12  ;;  %v1064_v24 = vadd.f32 1.1920929e-07, %v1062_v22 }
 0x528   : > { %v1061_v19 = vpop.xlane.xlu0 %1060 }
 0x529   : > { %v1063_v20 = vmul.f32 0.0625, %v1061_v19 }
 0x52a   : > { %v1128_v29 = vpop.permute.xlu1 %1127 }
 0x52b   : > { %v1065_v23 = vadd.f32 1.1920929e-07, %v1063_v20 }
 0x52d   : > { %2356 = vrsqrt.f32 %v1065_v23 }
 0x52e   : > { %2358 = vrsqrt.f32 %v1064_v24  ;;  %v1108_v38 = vpop.permute.xlu1 %1107 }
 0x52f   : > { %v2353_v58 = vpop.eup %2352 }
 0x530   : > { %v2690_v10 = vmul.f32 %v2353_v58, %v2454_v0 }
 0x531   : > { %v2355_v63 = vpop.eup %2354 }
 0x532   : > { %v1170_v60 = vmul.f32 %v1168_v59, %v2690_v10  ;;  %v2718_v14 = vmul.f32 %v2355_v63, %v2457_v1  ;;  %v1163_v41 = vpop.permute.xlu1 %1162 }
 0x534   : > { %1174 = vrot.lane.b32.xlu1 %v1170_v60, %s2404_s24  ;;  %v1171_v17 = vmul.f32 %v1168_v59, %v2718_v14  ;;  %v1166_v16 = vmul.f32 %v1163_v41, %v2718_v14 }
 0x537   : > { %v2357_v25 = vpop.eup %2356 }
 0x538   : > { %1142 = vrot.lane.b32.xlu1 %v2683_v44, %s2416_s9  ;;  %v2359_v27 = vpop.eup %2358  ;;  %v1069_v28 = vmul.f32 0.25, %v2357_v25 }
 0x539   : > { %v1068_v31 = vmul.f32 0.25, %v2359_v27 }
 0x53a   : > { %v2114_v61 = vpop.f32.mrb[0].mxu1  ;;  %v1071_v32 = vmul.f32 %v1069_v28, %v2457_v1 }
 0x53b   : > { %603 = vst.msk [vmem:[%s2698_s15 + $0x8] sm:$0xff] %vm186_vm0, %v2114_v61  ;;  %v593_v62 = vpop.f32.mrb[1].mxu1  ;;  %v1070_v34 = vmul.f32 %v1068_v31, %v2454_v0  ;;  %v1165_v0 = vmul.f32 %v1163_v41, %v2690_v10 }
 0x53c   : > { %602 = vst.msk [vmem:[%s2698_s15] sm:$0xff] %vm186_vm0, %v593_v62  ;;  %v1131_v39 = vmul.f32 %v1128_v29, %v1071_v32  ;;  %v1111_v45 = vmul.f32 %v1108_v38, %v1071_v32 }
 0x53d   : > { %v1130_v40 = vmul.f32 %v1128_v29, %v1070_v34  ;;  %v1110_v1 = vmul.f32 %v1108_v38, %v1070_v34 }
 0x565   : > { %v2128_v4 = vpop.f32.mrb[2].mxu1 }
 0x566   : > { %v2709_v5 = vsel %vm183_vm3, %v2128_v4, -1e+30  ;;  %v917_v6 = vpop.f32.mrb[3].mxu1 }
 0x567   : > { %v931_v7 = vsel %vm186_vm0, %v2709_v5, -inf  ;;  %v926_v8 = vsel %vm182_vm4, %v917_v6, -1e+30 }
 0x568   : > { %932 = vmax.xlane.f32.xlu0 %v931_v7  ;;  %v928_v51 = vsel %vm186_vm0, %v926_v8, -inf }
 0x56c   : > { %929 = vmax.xlane.f32.xlu0 %v928_v51 }
 0x582   : > { %1147 = vrot.lane.b32.xlu0 %v1105_v43, %s2414_s7 }
 0x586   : > { %1176 = vrot.lane.b32.xlu0 %v1171_v17, %s2404_s24 }
 0x58a   : > { %1122 = vrot.lane.b32.xlu0 %v2683_v44, %s2413_s6 }
 0x5a6   : > { %v1175_v46 = vpop.permute.xlu1 %1174 }
 0x5a7   : > { %v1180_v49 = vsub.f32 %v1165_v0, %v1175_v46 }
 0x5aa   : > { %v1143_v59 = vpop.permute.xlu1 %1142 }
 0x5ab   : > { %v1145_v61 = vmul.f32 %v1143_v59, %v2690_v10  ;;  %v1146_v62 = vmul.f32 %v1143_v59, %v2718_v14 }
 0x5f5   : > { %v933_v26 = vpop.xlane.xlu0 %932 }
 0x5f9   : > { %v930_v30 = vpop.xlane.xlu0 %929 }
 0x5fa   : > { %v934_v52 = vsub.f32 %v926_v8, %v930_v30 }
 0x5fc   : > { %v936_v55 = vmul.f32 1.442695, %v934_v52 }
 0x5fd   : > { %v1148_v33 = vpop.permute.xlu0 %1147 }
 0x5fe   : > { %v1150_v35 = vmul.f32 %v1148_v33, %v2690_v10  ;;  %v1151_v36 = vmul.f32 %v1148_v33, %v2718_v14  ;;  %2360 = vpow2.f32 %v936_v55  ;;  %v1538_v55 = vsub.s32 3, %v2478_v11 }
 0x600   : > { %1156 = vrot.lane.b32.xlu0 %v1151_v36, %s2405_s25  ;;  %1154 = vrot.lane.b32.xlu1 %v1150_v35, %s2405_s25 }
 0x601   : > { %v1177_v42 = vpop.permute.xlu0 %1176 }
 0x602   : > { %v1181_v43 = vsub.f32 %v1166_v16, %v1177_v42 }
 0x604   : > { %1136 = vrot.lane.b32.xlu0 %v1131_v39, %s2404_s24  ;;  %1134 = vrot.lane.b32.xlu1 %v1130_v40, %s2404_s24  ;;  %v2298_v50 = vpack.i.bf16 %v1181_v43, %v1180_v49 }
 0x605   : > { %v1123_v60 = vpop.permute.xlu0 %1122 }
 0x606   : > { %v1125_v8 = vmul.f32 %v1123_v60, %v1070_v34  ;;  %v1126_v63 = vmul.f32 %v1123_v60, %v1071_v32 }
 0x608   : > { %1114 = vrot.lane.b32.xlu0 %v1110_v1, %s2405_s25  ;;  %1097 = vrot.lane.b32.xlu1 %v2683_v44, %s2415_s8  ;;  %v935_v44 = vsub.f32 %v2709_v5, %v933_v26  ;;  %v2361_v47 = vpop.eup %2360 }
 0x609   : > { %v940_v48 = vsel %vm186_vm0, %v2361_v47, 0.0 }
 0x60a   : > { %v938_v56 = vmul.f32 1.442695, %v935_v44  ;;  %v1549_v44 = vrot.slane %v2484_v13, %v1538_v55 }
 0x60c   : > { %2294 = vrot.lane.b32.xlu0 %v2740_v37, %s2408_s28  ;;  %1116 = vrot.lane.b32.xlu1 %v1111_v45, %s2405_s25  ;;  %2362 = vpow2.f32 %v938_v56 }
 0x610   : > { %2299 = vrot.lane.b32.xlu1 %v2298_v50, %s2411_s4 }
 0x616   : > { %v2363_v57 = vpop.eup %2362 }
 0x617   : > { %v943_v58 = vsel %vm186_vm0, %v2363_v57, 0.0 }
 0x62b   : > { %941 = vadd.xlane.f32.xlu0 %v940_v48 }
 0x634   : > { %944 = vadd.xlane.f32.xlu1 %v943_v58 }
 0x672   : > { %v1155_v4 = vpop.permute.xlu1 %1154  ;;  %v1157_v6 = vpop.permute.xlu0 %1156 }
 0x673   : > { %v1160_v7 = vadd.f32 %v1155_v4, %v1145_v61  ;;  %v1161_v5 = vadd.f32 %v1157_v6, %v1146_v62  ;;  %v2392_v4 = vld [vmem:[%s2451_s17] sm:$0xff] }
 0x675   : > { %v2303_v9 = vpack.i.bf16 %v1161_v5, %v1160_v7  ;;  %v1539_v7 = vrot.slane %v2491_v15, %v1538_v55 }
 0x676   : > { %v1135_v51 = vpop.permute.xlu1 %1134  ;;  %v1137_v12 = vpop.permute.xlu0 %1136 }
 0x677   : > { %v1140_v17 = vsub.f32 %v1125_v8, %v1135_v51  ;;  %2304 = vrot.lane.b32.xlu0 %v2303_v9, %s2415_s8  ;;  %v1141_v18 = vsub.f32 %v1126_v63, %v1137_v12 }
 0x679   : > { %1184 = vrot.lane.b32.xlu1 %v1140_v17, %s2412_s5 }
 0x67a   : > { %v1098_v19 = vpop.permute.xlu1 %1097  ;;  %v1115_v20 = vpop.permute.xlu0 %1114 }
 0x67b   : > { %v1100_v10 = vmul.f32 %v1098_v19, %v1070_v34  ;;  %1186 = vrot.lane.b32.xlu0 %v1141_v18, %s2412_s5  ;;  %v1101_v14 = vmul.f32 %v1098_v19, %v1071_v32 }
 0x67d   : > { %v1120_v22 = vadd.f32 %v1115_v20, %v1100_v10  ;;  %v2393_v10 = vld [vmem:[%s2451_s17 + $0x10] sm:$0xff] }
 0x67e   : > { %v1117_v23 = vpop.permute.xlu1 %1116  ;;  %v2295_v24 = vpop.permute.xlu0 %2294 }
 0x67f   : > { %v1121_v25 = vadd.f32 %v1117_v23, %v1101_v14  ;;  %1279 = vrot.lane.b32.xlu1 %v1120_v22, %s2416_s9  ;;  %v2297_v26 = vunpack.i.h.bf16 %v2295_v24  ;;  %v2296_v27 = vunpack.i.l.bf16 %v2295_v24 }
 0x681   : > { %v2206_v28 = vpack.c.bf16 %v2297_v26, %v2296_v27  ;;  %1281 = vrot.lane.b32.xlu0 %v1121_v25, %s2416_s9 }
 0x682   : > { %v2300_v29 = vpop.permute.xlu1 %2299 }
 0x683   : > { %v2302_v30 = vunpack.i.h.bf16 %v2300_v29  ;;  %v2301_v31 = vunpack.i.l.bf16 %v2300_v29  ;;  %2207 = vmatprep.subr.bf16.mxu0 %v2206_v28  ;;  %1516 = vrot.lane.b32.xlu1 %v2461_v2, %s2410_s30 }
 0x684   : > { %2209 = vmatpush3.bf16.msra.mxu0 %v2206_v28 }
 0x685   : > { %v2210_v32 = vpack.c.bf16 %v2302_v30, %v2301_v31  ;;  %1518 = vrot.lane.b32.xlu0 %v2465_v3, %s2410_s30 }
 0x687   : > { %2212 = vmatprep.subr.msk.bf16.mxu0 %vm2540_vm2, %v2210_v32  ;;  %1494 = vrot.lane.b32.xlu1 %v2461_v2, %s2409_s29 }
 0x689   : > { %1496 = vrot.lane.b32.xlu0 %v2465_v3, %s2409_s29 }
 0x6b8   : > { %v942_v33 = vpop.xlane.xlu0 %941 }
 0x6b9   : > { %2364 = vrcp.f32 %v942_v33 }
 0x6c1   : > { %v945_v34 = vpop.xlane.xlu1 %944 }
 0x6c2   : > { %2366 = vrcp.f32 %v945_v34 }
 0x6c3   : > { %v2365_v35 = vpop.eup %2364 }
 0x6c4   : > { %v948_v36 = vmul.f32 %v2365_v35, %v2361_v47 }
 0x6c6   : > { %2133 = vmatprep.mubr.msk.f32.mxu0 %vm186_vm0, %v948_v36 }
 0x6cc   : > { %v2367_v38 = vpop.eup %2366 }
 0x6cd   : > { %v949_v39 = vmul.f32 %v2367_v38, %v2363_v57 }
 0x6cf   : > { %2134 = vmatmul.mubr.msk.f32.vlgmr.msra.gmra.mrb[2].mxu0 %vm186_vm0, %v949_v39 }
 0x6d0   : > { %2215 = vmatpush3.bf16.xpose.msk.msra.mxu0 %vm2540_vm2, %v2210_v32 }
 0x6e9   : > { %v2305_v40 = vpop.permute.xlu0 %2304 }
 0x6ea   : > { %v2307_v2 = vunpack.i.h.bf16 %v2305_v40  ;;  %v2306_v41 = vunpack.i.l.bf16 %v2305_v40 }
 0x6eb   : > { %v1185_v1 = vpop.permute.xlu1 %1184 }
 0x6ec   : > { %v2216_v3 = vpack.c.bf16 %v2307_v2, %v2306_v41  ;;  %2140 = vmatprep.mubr.msk.f32.mxu0 %vm322_vm1, %v1185_v1 }
 0x6ed   : > { %v1187_v42 = vpop.permute.xlu0 %1186 }
 0x6ee   : > { %2141 = vmatmul.mubr.msk.f32.vlgmr.msra.gmra.mrb[4].mxu0 %vm322_vm1, %v1187_v42  ;;  %2218 = vmatprep.subr.msk.bf16.mxu0 %vm2540_vm2, %v2216_v3 }
 0x6ef   : > { %2221 = vmatpush3.bf16.xpose.msk.msra.mxu0 %vm2540_vm2, %v2216_v3 }
 0x6f1   : > { %v1280_v0 = vpop.permute.xlu1 %1279 }
 0x6f2   : > { %2147 = vmatprep.mubr.msk.f32.mxu0 %vm322_vm1, %v1280_v0 }
 0x6f3   : > { %v1282_v16 = vpop.permute.xlu0 %1281 }
 0x6f5   : > { %v1517_v43 = vpop.permute.xlu1 %1516 }
 0x6f6   : > { %2148 = vmatmul.mubr.msk.f32.vlgmr.msra.gmra.mrb[4].mxu0 %vm322_vm1, %v1282_v16  ;;  %v1522_v45 = vsel %vm186_vm0, %v1517_v43, 0.0 }
 0x6f7   : > { %1523 = vadd.xlane.f32.xlu1 %v1522_v45  ;;  %v1519_v46 = vpop.permute.xlu0 %1518 }
 0x6f8   : > { %v1525_v49 = vsel %vm186_vm0, %v1519_v46, 0.0 }
 0x6f9   : > { %1526 = vadd.xlane.f32.xlu0 %v1525_v49  ;;  %v1495_v50 = vpop.permute.xlu1 %1494 }
 0x6fa   : > { %v1500_v52 = vsel %vm186_vm0, %v1495_v50, 0.0 }
 0x6fb   : > { %v1497_v56 = vpop.permute.xlu0 %1496 }
 0x6fc   : > { %v1503_v47 = vsel %vm186_vm0, %v1497_v56, 0.0 }
 0x6fd   : > { %1501 = vadd.xlane.f32.xlu0 %v1500_v52  ;;  %1504 = vadd.xlane.f32.xlu1 %v1503_v47 }
 0x713   : > { %1611 = vrot.lane.b32.xlu0 %v1549_v44, %s2408_s28 }
 0x717   : > { %1571 = vrot.lane.b32.xlu0 %v1549_v44, %s2407_s27 }
 0x71b   : > { %1551 = vrot.lane.b32.xlu0 %v1549_v44, %s2406_s26 }
 0x784   : > { %v1524_v48 = vpop.xlane.xlu1 %1523 }
 0x785   : > { %v1528_v57 = vmul.f32 0.0625, %v1524_v48 }
 0x786   : > { %v1527_v59 = vpop.xlane.xlu0 %1526 }
 0x787   : > { %v1530_v58 = vadd.f32 1.1920929e-07, %v1528_v57  ;;  %v1529_v15 = vmul.f32 0.0625, %v1527_v59 }
 0x789   : > { %2368 = vrsqrt.f32 %v1530_v58  ;;  %v1531_v19 = vadd.f32 1.1920929e-07, %v1529_v15 }
 0x78a   : > { %v1502_v60 = vpop.xlane.xlu0 %1501  ;;  %v1505_v23 = vpop.xlane.xlu1 %1504 }
 0x78b   : > { %2370 = vrsqrt.f32 %v1531_v19  ;;  %v1506_v24 = vmul.f32 0.0625, %v1502_v60  ;;  %v1507_v25 = vmul.f32 0.0625, %v1505_v23 }
 0x78d   : > { %v1508_v26 = vadd.f32 1.1920929e-07, %v1506_v24  ;;  %v1509_v27 = vadd.f32 1.1920929e-07, %v1507_v25 }
 0x78e   : > { %v1612_v62 = vpop.permute.xlu0 %1611 }
 0x78f   : > { %2372 = vrsqrt.f32 %v1508_v26 }
 0x790   : > { %2374 = vrsqrt.f32 %v1509_v27 }
 0x792   : > { %v1572_v34 = vpop.permute.xlu0 %1571 }
 0x793   : > { %v2369_v61 = vpop.eup %2368 }
 0x794   : > { %v2788_v13 = vmul.f32 %v2392_v4, %v2369_v61 }
 0x795   : > { %v2371_v20 = vpop.eup %2370 }
 0x796   : > { %v1614_v6 = vmul.f32 %v1612_v62, %v2788_v13  ;;  %v1535_v14 = vmul.f32 %v2393_v10, %v2371_v20  ;;  %v1552_v1 = vpop.permute.xlu0 %1551 }
 0x798   : > { %1618 = vrot.lane.b32.xlu0 %v1614_v6, %s2404_s24  ;;  %v1615_v22 = vmul.f32 %v1612_v62, %v1535_v14 }
 0x799   : > { %v2373_v28 = vpop.eup %2372 }
 0x79a   : > { %v2375_v29 = vpop.eup %2374  ;;  %v1512_v31 = vmul.f32 0.25, %v2373_v28 }
 0x79b   : > { %v1513_v32 = vmul.f32 0.25, %v2375_v29 }
 0x79c   : > { %1586 = vrot.lane.b32.xlu0 %v1539_v7, %s2408_s28  ;;  %v1514_v35 = vmul.f32 %v2392_v4, %v1512_v31 }
 0x79d   : > { %v1515_v36 = vmul.f32 %v2393_v10, %v1513_v32 }
 0x79e   : > { %v1574_v2 = vmul.f32 %v1572_v34, %v1514_v35  ;;  %v1554_v42 = vmul.f32 %v1552_v1, %v1514_v35 }
 0x79f   : > { %v1575_v41 = vmul.f32 %v1572_v34, %v1515_v36  ;;  %v1555_v52 = vmul.f32 %v1552_v1, %v1515_v36 }
 0x7a2   : > { %v2794_v5 = vpop.f32.mrb[2].mxu0 }
 0x7a3   : > { %v2796_v8 = vpop.f32.mrb[3].mxu0 }
 0x7c9   : > { %v2149_v9 = vpop.f32.mrb[4].mxu0 }
 0x7ca   : > { %v1373_v51 = vsel %vm183_vm3, %v2149_v9, -1e+30  ;;  %v1363_v12 = vpop.f32.mrb[5].mxu0 }
 0x7cb   : > { %v1377_v63 = vsel %vm186_vm0, %v1373_v51, -inf  ;;  %v2805_v17 = vsel %vm182_vm4, %v1363_v12, -1e+30 }
 0x7cc   : > { %1378 = vmax.xlane.f32.xlu1 %v1377_v63  ;;  %v1374_v18 = vsel %vm186_vm0, %v2805_v17, -inf }
 0x7d0   : > { %1375 = vmax.xlane.f32.xlu1 %v1374_v18 }
 0x7e1   : > { %1591 = vrot.lane.b32.xlu1 %v1549_v44, %s2405_s25 }
 0x7e5   : > { %1606 = vrot.lane.b32.xlu1 %v1539_v7, %s2405_s25 }
 0x7e9   : > { %1620 = vrot.lane.b32.xlu1 %v1615_v22, %s2404_s24 }
 0x7ed   : > { %1566 = vrot.lane.b32.xlu1 %v1539_v7, %s2406_s26 }
 0x80a   : > { %v1619_v46 = vpop.permute.xlu0 %1618 }
 0x80e   : > { %v1587_v48 = vpop.permute.xlu0 %1586 }
 0x80f   : > { %v1589_v58 = vmul.f32 %v1587_v48, %v2788_v13  ;;  %v1590_v59 = vmul.f32 %v1587_v48, %v1535_v14 }
 0x859   : > { %v1379_v30 = vpop.xlane.xlu1 %1378 }
 0x85a   : > { %v1381_v55 = vsub.f32 %v1373_v51, %v1379_v30 }
 0x85c   : > { %v1384_v44 = vmul.f32 1.442695, %v1381_v55 }
 0x85d   : > { %v1376_v33 = vpop.xlane.xlu1 %1375 }
 0x85e   : > { %2376 = vpow2.f32 %v1384_v44 }
 0x861   : > { %v1592_v38 = vpop.permute.xlu1 %1591 }
 0x862   : > { %v1594_v39 = vmul.f32 %v1592_v38, %v2788_v13  ;;  %v1595_v40 = vmul.f32 %v1592_v38, %v1535_v14 }
 0x864   : > { %1600 = vrot.lane.b32.xlu1 %v1595_v40, %s2405_s25  ;;  %1598 = vrot.lane.b32.xlu0 %v1594_v39, %s2405_s25 }
 0x865   : > { %v1607_v3 = vpop.permute.xlu1 %1606 }
 0x866   : > { %v1609_v0 = vmul.f32 %v1607_v3, %v2788_v13  ;;  %v1610_v16 = vmul.f32 %v1607_v3, %v1535_v14  ;;  %v1380_v13 = vsub.f32 %v2805_v17, %v1376_v33 }
 0x868   : > { %1580 = vrot.lane.b32.xlu1 %v1575_v41, %s2404_s24  ;;  %1578 = vrot.lane.b32.xlu0 %v1574_v2, %s2404_s24  ;;  %v1624_v49 = vsub.f32 %v1609_v0, %v1619_v46  ;;  %v2377_v56 = vpop.eup %2376  ;;  %v1382_v20 = vmul.f32 1.442695, %v1380_v13 }
 0x869   : > { %v1621_v43 = vpop.permute.xlu1 %1620  ;;  %v1389_v47 = vsel %vm186_vm0, %v2377_v56, 0.0 }
 0x86a   : > { %v1625_v45 = vsub.f32 %v1610_v16, %v1621_v43  ;;  %2378 = vpow2.f32 %v1382_v20 }
 0x86c   : > { %1558 = vrot.lane.b32.xlu1 %v1554_v42, %s2405_s25  ;;  %1541 = vrot.lane.b32.xlu0 %v1539_v7, %s2407_s27  ;;  %v2313_v50 = vpack.i.bf16 %v1625_v45, %v1624_v49 }
 0x86d   : > { %v1567_v57 = vpop.permute.xlu1 %1566 }
 0x86e   : > { %v1569_v6 = vmul.f32 %v1567_v57, %v1514_v35  ;;  %v1570_v22 = vmul.f32 %v1567_v57, %v1515_v36 }
 0x870   : > { %1560 = vrot.lane.b32.xlu0 %v1555_v52, %s2405_s25  ;;  %2314 = vrot.lane.b32.xlu1 %v2313_v50, %s2404_s24 }
 0x874   : > { %v2379_v10 = vpop.eup %2378 }
 0x875   : > { %v1386_v14 = vsel %vm186_vm0, %v2379_v10, 0.0 }
 0x88f   : > { %1390 = vadd.xlane.f32.xlu0 %v1389_v47 }
 0x8a5   : > { %2309 = vrot.lane.b32.xlu0 %v2740_v37, %s2416_s9 }
 0x8d6   : > { %v1599_v60 = vpop.permute.xlu0 %1598  ;;  %v1601_v61 = vpop.permute.xlu1 %1600 }
 0x8d7   : > { %v1604_v62 = vadd.f32 %v1599_v60, %v1589_v58  ;;  %v1605_v4 = vadd.f32 %v1601_v61, %v1590_v59 }
 0x8d9   : > { %v2318_v7 = vpack.i.bf16 %v1605_v4, %v1604_v62 }
 0x8da   : > { %v1579_v9 = vpop.permute.xlu0 %1578  ;;  %v1581_v51 = vpop.permute.xlu1 %1580 }
 0x8db   : > { %v1584_v12 = vsub.f32 %v1569_v6, %v1579_v9  ;;  %2319 = vrot.lane.b32.xlu1 %v2318_v7, %s2410_s30  ;;  %v1585_v23 = vsub.f32 %v1570_v22, %v1581_v51 }
 0x8dd   : > { %1628 = vrot.lane.b32.xlu0 %v1584_v12, %s2403_s23 }
 0x8de   : > { %v1542_v63 = vpop.permute.xlu0 %1541  ;;  %v1559_v18 = vpop.permute.xlu1 %1558 }
 0x8df   : > { %v1544_v15 = vmul.f32 %v1542_v63, %v1514_v35  ;;  %v1545_v25 = vmul.f32 %v1542_v63, %v1515_v36 }
 0x8e1   : > { %v1564_v19 = vadd.f32 %v1559_v18, %v1544_v15 }
 0x8e2   : > { %v1561_v24 = vpop.permute.xlu0 %1560  ;;  %v2315_v28 = vpop.permute.xlu1 %2314 }
 0x8e3   : > { %1723 = vrot.lane.b32.xlu0 %v1564_v19, %s2409_s29  ;;  %v1565_v26 = vadd.f32 %v1561_v24, %v1545_v25  ;;  %v2317_v30 = vunpack.i.h.bf16 %v2315_v28  ;;  %v2316_v17 = vunpack.i.l.bf16 %v2315_v28 }
 0x8e5   : > { %v2226_v34 = vpack.c.bf16 %v2317_v30, %v2316_v17 }
 0x8ff   : > { %1387 = vadd.xlane.f32.xlu1 %v1386_v14 }
 0x910   : > { %1630 = vrot.lane.b32.xlu1 %v1585_v23, %s2403_s23 }
 0x914   : > { %1725 = vrot.lane.b32.xlu1 %v1565_v26, %s2409_s29 }
 0x91c   : > { %v1391_v27 = vpop.xlane.xlu0 %1390 }
 0x91d   : > { %2380 = vrcp.f32 %v1391_v27 }
 0x920   : > { %v2310_v29 = vpop.permute.xlu0 %2309 }
 0x921   : > { %v2312_v31 = vunpack.i.h.bf16 %v2310_v29  ;;  %v2311_v32 = vunpack.i.l.bf16 %v2310_v29 }
 0x923   : > { %v2222_v33 = vpack.c.bf16 %v2312_v31, %v2311_v32 }
 0x925   : > { %2223 = vmatprep.subr.bf16.mxu1 %v2222_v33 }
 0x926   : > { %2225 = vmatpush3.bf16.msra.mxu1 %v2222_v33 }
 0x927   : > { %2228 = vmatprep.subr.msk.bf16.mxu1 %vm2540_vm2, %v2226_v34  ;;  %v2381_v38 = vpop.eup %2380 }
 0x928   : > { %v1395_v1 = vmul.f32 %v2381_v38, %v2377_v56 }
 0x94d   : > { %v2320_v35 = vpop.permute.xlu1 %2319 }
 0x94e   : > { %v2322_v40 = vunpack.i.h.bf16 %v2320_v35  ;;  %v2321_v2 = vunpack.i.l.bf16 %v2320_v35 }
 0x94f   : > { %v1629_v42 = vpop.permute.xlu0 %1628 }
 0x950   : > { %v2232_v3 = vpack.c.bf16 %v2322_v40, %v2321_v2 }
 0x955   : > { %v1724_v16 = vpop.permute.xlu0 %1723 }
 0x98c   : > { %v1388_v36 = vpop.xlane.xlu1 %1387 }
 0x98d   : > { %2382 = vrcp.f32 %v1388_v36 }
 0x990   : > { %v1631_v0 = vpop.permute.xlu1 %1630 }
 0x994   : > { %v1726_v43 = vpop.permute.xlu1 %1725 }
 0x997   : > { %v2383_v39 = vpop.eup %2382 }
 0x998   : > { %v1394_v41 = vmul.f32 %v2383_v39, %v2379_v10 }
 0x99a   : > { %2154 = vmatprep.mubr.msk.f32.mxu1 %vm186_vm0, %v1394_v41 }
 0x99b   : > { %2155 = vmatmul.mubr.msk.f32.vlgmr.msra.gmra.mrb[4].mxu1 %vm186_vm0, %v1395_v1 }
 0x99c   : > { %2231 = vmatpush3.bf16.xpose.msk.msra.mxu1 %vm2540_vm2, %v2226_v34  ;;  %2161 = vmatprep.mubr.msk.f32.mxu1 %vm322_vm1, %v1629_v42 }
 0x99d   : > { %2234 = vmatprep.subr.msk.bf16.mxu1 %vm2540_vm2, %v2232_v3 }
 0x9a3   : > { %2162 = vmatmul.mubr.msk.f32.vlgmr.msra.gmra.mrb[6].mxu1 %vm322_vm1, %v1631_v0 }
 0x9a4   : > { %2237 = vmatpush3.bf16.xpose.msk.msra.mxu1 %vm2540_vm2, %v2232_v3  ;;  %2168 = vmatprep.mubr.msk.f32.mxu1 %vm322_vm1, %v1724_v16 }
 0x9ab   : > { %2169 = vmatmul.mubr.msk.f32.vlgmr.msra.gmra.mrb[6].mxu1 %vm322_vm1, %v1726_v43 }
 0xa6e   : > { %v2156_v45 = vpop.f32.mrb[4].mxu1 }
 0xa6f   : > { %v1474_v46 = vpop.f32.mrb[5].mxu1 }
 0xa7e   : > { %v2170_v49 = vpop.f32.mrb[6].mxu1 }
 0xa7f   : > { %v1817_v50 = vsel %vm183_vm3, %v2170_v49, -1e+30  ;;  %v1807_v52 = vpop.f32.mrb[7].mxu1 }
 0xa80   : > { %v1821_v55 = vsel %vm186_vm0, %v1817_v50, -inf  ;;  %v1816_v21 = vsel %vm182_vm4, %v1807_v52, -1e+30 }
 0xa81   : > { %v1818_v44 = vsel %vm186_vm0, %v1816_v21, -inf  ;;  %1822 = vmax.xlane.f32.xlu1 %v1821_v55 }
 0xa82   : > { %1819 = vmax.xlane.f32.xlu0 %v1818_v44 }
 0xa92   : > { %2324 = vrot.lane.b32.xlu1 %v2740_v37, %s2409_s29 }
 0xa96   : > { %1043 = vrot.lane.b32.xlu1 %v2794_v5, %s2410_s30 }
 0xa9a   : > { %1485 = vrot.lane.b32.xlu1 %v1474_v46, %s2415_s8 }
 0xb0e   : > { %v1823_v53 = vpop.xlane.xlu1 %1822 }
 0xb0f   : > { %v1825_v56 = vsub.f32 %v1817_v50, %v1823_v53  ;;  %v1820_v47 = vpop.xlane.xlu0 %1819 }
 0xb10   : > { %v1824_v48 = vsub.f32 %v1816_v21, %v1820_v47 }
 0xb11   : > { %v1828_v57 = vmul.f32 1.442695, %v1825_v56 }
 0xb12   : > { %v1826_v11 = vmul.f32 1.442695, %v1824_v48  ;;  %v2325_v54 = vpop.permute.xlu1 %2324 }
 0xb13   : > { %v2327_v58 = vunpack.i.h.bf16 %v2325_v54  ;;  %v2326_v59 = vunpack.i.l.bf16 %v2325_v54 }
 0xb14   : > { %2384 = vpow2.f32 %v1826_v11 }
 0xb15   : > { %v2238_v60 = vpack.c.bf16 %v2327_v58, %v2326_v59  ;;  %2386 = vpow2.f32 %v1828_v57 }
 0xb16   : > { %v1044_v37 = vpop.permute.xlu1 %1043 }
 0xb17   : > { %1049 = vst.msk [vmem:[%s2698_s15 + $0x8] sm:$0xff] %vm1047_vm5, %v1044_v37  ;;  %2239 = vmatprep.subr.bf16.mxu0 %v2238_v60 }
 0xb18   : > { %2241 = vmatpush3.bf16.msra.mxu0 %v2238_v60 }
 0xb1a   : > { %v1486_v51 = vpop.permute.xlu1 %1485 }
 0xb1e   : > { %v2385_v5 = vpop.eup %2384 }
 0xb1f   : > { %v1830_v61 = vsel %vm186_vm0, %v2385_v5, 0.0  ;;  %v2387_v62 = vpop.eup %2386 }
 0xb20   : > { %1831 = vadd.xlane.f32.xlu0 %v1830_v61  ;;  %v1833_v4 = vsel %vm186_vm0, %v2387_v62, 0.0 }
 0xb24   : > { %1834 = vadd.xlane.f32.xlu0 %v1833_v4 }
 0xb3a   : > { %1041 = vrot.lane.b32.xlu0 %v2796_v8, %s2410_s30 }
 0xb3e   : > { %1487 = vrot.lane.b32.xlu0 %v2156_v45, %s2415_s8 }
 0xbad   : > { %v1832_v6 = vpop.xlane.xlu0 %1831 }
 0xbae   : > { %2388 = vrcp.f32 %v1832_v6 }
 0xbb1   : > { %v1835_v7 = vpop.xlane.xlu0 %1834 }
 0xbb2   : > { %2390 = vrcp.f32 %v1835_v7 }
 0xbb5   : > { %v1042_v9 = vpop.permute.xlu0 %1041 }
 0xbb6   : > { %1048 = vst.msk [vmem:[%s2698_s15] sm:$0xff] %vm1047_vm5, %v1042_v9 }
 0xbb7   : > { %1492 = vst.msk [vmem:[%s2698_s15] sm:$0xff] %vm1491_vm6, %v1486_v51 }
 0xbb8   : > { %v2389_v12 = vpop.eup %2388 }
 0xbb9   : > { %v1488_v63 = vpop.permute.xlu0 %1487  ;;  %v1838_v15 = vmul.f32 %v2389_v12, %v2385_v5 }
 0xbba   : > { %1493 = vst.msk [vmem:[%s2698_s15 + $0x8] sm:$0xff] %vm1491_vm6, %v1488_v63 }
 0xbbb   : > { %2175 = vmatprep.mubr.msk.f32.mxu0 %vm186_vm0, %v1838_v15 }
 0xbbc   : > { %v2391_v8 = vpop.eup %2390 }
 0xbbd   : > { %v1839_v18 = vmul.f32 %v2391_v8, %v2387_v62 }
 0xbbf   : > { %2176 = vmatmul.mubr.msk.f32.vlgmr.msra.gmra.mrb[6].mxu0 %vm186_vm0, %v1839_v18 }
 0xc92   : > { %v2177_v19 = vpop.f32.mrb[6].mxu0 }
 0xc93   : > { %1931 = vrot.lane.b32.xlu0 %v2177_v19, %s2407_s27  ;;  %v1918_v13 = vpop.f32.mrb[7].mxu0 }
 0xc94   : > { %1929 = vrot.lane.b32.xlu1 %v1918_v13, %s2407_s27 }
 0xd05   : > { %v1932_v20 = vpop.permute.xlu0 %1931 }
 0xd06   : > { %1937 = vst.msk [vmem:[%s2698_s15 + $0x8] sm:$0xff] %vm1935_vm7, %v1932_v20  ;;  %v1930_v10 = vpop.permute.xlu1 %1929 }
 0xd07   : > { %1936 = vst.msk [vmem:[%s2698_s15] sm:$0xff] %vm1935_vm7, %v1930_v10 }
 0xd08 PF: > { %s13_s12 = sadd.s32 1, %s2400_s12  }
 0xd09   : > { %p10_p4 = scmp.ge.s32.totalorder %s13_s12, 4  }
 0xd0b   :  { %12 = sbr.rel (!%p10_p4) target bundleno = 1 (0x1), region = 62 }

</bundles_post_ra>
